<compile_context>
chip_gen: v7x
topology: tpu7x:2x2x1
jax: 0.10.0
libtpu: 0.0.40
codegen_flags: <defaults>
</compile_context>

<pallas_src>
import jax
import jax.numpy as jnp
from jax.experimental import pallas as pl
from jax.experimental.pallas import tpu as pltpu


# ---------------------------------------------------------------------------
# In-kernel layer helpers (traced inside the single fused kernel)
# ---------------------------------------------------------------------------
def _tconv_layer(x, w_ref, bias, s_ref, contract_x_dim):
    """ConvTranspose1d(k=3, stride=2, pad=1) + ReLU, batch folded into lanes.

    x     : (B*Li, C_in) channels-last  (contract_x_dim=1) or
            (C_in, B*Li) channels-first (contract_x_dim=0)
    w_ref : (3, C_out, C_in)  tap-major, pre-transposed
    bias  : (C_out, 1)
    s_ref : (3, B*Li, B*Lo)   block-diagonal 0/1 scatter matrices, Lo = 2*Li-1
    returns (C_out, B*Lo)
    """
    dn = (((1,), (contract_x_dim,)), ((), ()))

    def tap(k):
        zk = jax.lax.dot_general(w_ref[k], x, dimension_numbers=dn,
                                 preferred_element_type=jnp.float32)
        return jnp.dot(zk, s_ref[k], preferred_element_type=jnp.float32)

    acc = tap(0)                    # init from first tap (no zeros + add)
    acc = acc + tap(1)
    acc = acc + tap(2)
    return jnp.maximum(acc + bias, 0.0)


def _vpu_matvecs(w_t, xs):
    """Compute w_t.T @ xs on the VPU/XLU (for 1-4 output channels).

    w_t: (R, C_out); xs: (R, L) -> (C_out, L).  Broadcast multiply + sublane
    reduce keeps the tiny-output convs off the MXU's push/pop tail.
    """
    cols = [jnp.sum(w_t[:, c:c + 1] * xs, axis=0, keepdims=True)
            for c in range(w_t.shape[1])]
    return cols[0] if len(cols) == 1 else jnp.concatenate(cols, axis=0)


# ---------------------------------------------------------------------------
# Host-side one-time parameter preparation
# ---------------------------------------------------------------------------
def tconv_scatter(Li):
    """0/1 placement matrices for ConvTranspose1d(k=3, stride=2, pad=1):
       out[:, 2m]   = W1^T x[:, m]
       out[:, 2m+1] = W0^T x[:, m+1] + W2^T x[:, m]
    """
    Lo = 2 * Li - 1
    S = jnp.zeros((3, Li, Lo), jnp.float32)
    m = jnp.arange(Li)
    S = S.at[1, m, 2 * m].set(1.0)                  # tap 1 -> even outputs
    i = jnp.arange(1, Li)
    S = S.at[0, i, 2 * i - 1].set(1.0)              # tap 0 -> odd outputs
    m2 = jnp.arange(Li - 1)
    S = S.at[2, m2, 2 * m2 + 1].set(1.0)            # tap 2 -> odd outputs
    return S


def linear_interp_matrix(L_in, L_out):
    """Reproduces F.interpolate(mode='linear', align_corners=False)."""
    scale = L_in / L_out
    j = jnp.arange(L_out, dtype=jnp.float32)
    src = jnp.maximum((j + 0.5) * scale - 0.5, 0.0)
    i0 = jnp.minimum(jnp.floor(src).astype(jnp.int32), L_in - 1)
    i1 = jnp.minimum(i0 + 1, L_in - 1)
    w1 = src - i0.astype(jnp.float32)
    w0 = 1.0 - w1
    rows = jnp.arange(L_out)
    M = jnp.zeros((L_out, L_in), jnp.float32)
    M = M.at[rows, i0].add(w0)
    M = M.at[rows, i1].add(w1)
    return M


def _batch_block_diag(mat, batch):
    """kron(I_batch, mat); for 3D input, applied per leading index."""
    eye = jnp.eye(batch, dtype=mat.dtype)
    if mat.ndim == 2:
        return jnp.kron(eye, mat)
    return jnp.stack([jnp.kron(eye, mat[k]) for k in range(mat.shape[0])])


def prepare_params(params, video_length, audio_length, batch):
    """One-time preprocessing of PyTorch-layout weights into kernel layout."""
    prep = {}
    L = video_length
    biases = []
    for i in (1, 2, 3):
        w = params[f"tw{i}"]                                 # (C_in, C_out, 3)
        prep[f"tw{i}"] = jnp.transpose(w, (2, 1, 0)).astype(jnp.float32)
        biases.append(params[f"tb{i}"].reshape(-1, 1).astype(jnp.float32))
        prep[f"ts{i}"] = _batch_block_diag(tconv_scatter(L), batch)
        L = 2 * L - 1
    prep["tb"] = jnp.concatenate(biases, axis=0)             # packed biases
    # Block-diagonal interpolation matrix: (B*L_mid, B*audio_length)
    prep["mt"] = _batch_block_diag(
        linear_interp_matrix(L, audio_length).T.astype(jnp.float32), batch)
    # Conv1d layers: fuse 3 taps + bias -> (C_out, 3*C_in + 1)
    for j in (1, 2, 3):
        w = params[f"cw{j}"].astype(jnp.float32)             # (C_out, C_in, 3)
        b = params[f"cb{j}"].astype(jnp.float32)             # (C_out,)
        wf = jnp.concatenate([w[:, :, 0], w[:, :, 1], w[:, :, 2], b[:, None]],
                             axis=1)
        if j == 1:
            prep["cw1"] = wf                                 # MXU path: (C_out, R)
        else:
            prep[f"cw{j}t"] = wf.T                           # VPU path: (R, C_out)
    return prep


# ---------------------------------------------------------------------------
# Fused forward (single pallas_call, no grid, batch folded into lanes)
# ---------------------------------------------------------------------------
_CONST_ORDER = ("tw1", "ts1", "tw2", "ts2", "tw3", "ts3", "tb", "mt",
                "cw1", "cw2t", "cw3t")


def feature2audio_forward(prep, x):
    """x: (B, video_length, video_feature) -> (B, audio_feature, audio_length)."""
    B, T, F = x.shape
    c1 = prep["tw1"].shape[1]
    c2 = prep["tw2"].shape[1]
    c3 = prep["tw3"].shape[1]
    assert prep["ts1"].shape[1] == B * T, "prep built for a different batch/length"
    a_len = prep["mt"].shape[1] // B
    a_feat = prep["cw3t"].shape[1]
    L = B * a_len                                            # folded lane length

    def kernel(x_ref, tw1, ts1, tw2, ts2, tw3, ts3, tb, mt,
               cw1, cw2t, cw3t, o_ref):
        # ---- packed tconv biases: static slices of one small buffer
        b1 = tb[0:c1, :]
        b2 = tb[c1:c1 + c2, :]
        b3 = tb[c1 + c2:c1 + c2 + c3, :]

        # ---- ConvTranspose1d x3 (+ReLU), channels-first, batch on lanes
        h = _tconv_layer(x_ref[...], tw1, b1, ts1, contract_x_dim=1)
        h = _tconv_layer(h, tw2, b2, ts2, contract_x_dim=0)
        h = _tconv_layer(h, tw3, b3, ts3, contract_x_dim=0)

        # ---- linear interpolation as one block-diagonal matmul
        h = jnp.dot(h, mt[...], preferred_element_type=jnp.float32)  # (F//8, B*a_len)

        # ---- shared boundary masks / ones row for all three Conv1d layers
        lane = jax.lax.broadcasted_iota(jnp.int32, (1, L), 1)
        left_edge = lane == 0
        right_edge = lane == a_len - 1
        for b in range(1, B):                                # static unroll
            left_edge = jnp.logical_or(left_edge, lane == b * a_len)
            right_edge = jnp.logical_or(right_edge, lane == (b + 1) * a_len - 1)
        keep_left = 1.0 - left_edge.astype(jnp.float32)      # (1, L)
        keep_right = 1.0 - right_edge.astype(jnp.float32)    # (1, L)
        ones_row = jnp.ones((1, L), jnp.float32)

        def stack_taps(z):
            # rows: [x(l-1); x(l); x(l+1); 1], zeroed at per-batch edges
            zm1 = pltpu.roll(z, 1, axis=1) * keep_left
            zp1 = pltpu.roll(z, L - 1, axis=1) * keep_right
            return jnp.concatenate([zm1, z, zp1, ones_row], axis=0)

        # conv1 (C_out = 4*audio_feature): single fused MXU matmul (bias folded)
        h = jnp.maximum(
            jnp.dot(cw1[...], stack_taps(h), preferred_element_type=jnp.float32),
            0.0)
        # conv2 (C_out = 2*audio_feature): VPU broadcast-mul + sublane reduce
        h = jnp.maximum(_vpu_matvecs(cw2t[...], stack_taps(h)), 0.0)
        # conv3 (C_out = audio_feature) + tanh
        y = jnp.tanh(_vpu_matvecs(cw3t[...], stack_taps(h)))  # (a_feat, B*a_len)

        # ---- un-fold the batch: lane-dense (multiple-of-128) stores
        for b in range(B):                                    # static unroll
            o_ref[b, :, :] = y[:, b * a_len:(b + 1) * a_len].astype(o_ref.dtype)

    consts = [prep[k] for k in _CONST_ORDER]
    x_flat = x.reshape(B * T, F)        # free reshape: (batch, time) row-major
    vmem = pl.BlockSpec(memory_space=pltpu.MemorySpace.VMEM)
    return pl.pallas_call(
        kernel,
        out_shape=jax.ShapeDtypeStruct((B, a_feat, a_len), jnp.float32),
        in_specs=[vmem] * (1 + len(consts)),
        out_specs=vmem,
    )(x_flat, *consts)


# ---------------------------------------------------------------------------
# Parameter init (matches the PyTorch module's shapes)
# ---------------------------------------------------------------------------
def init_params(key, video_feature, audio_feature):
    F = video_feature
    A = audio_feature
    shapes = {
        # ConvTranspose1d weights: (C_in, C_out, K)
        "tw1": (F, F // 2, 3), "tb1": (F // 2,),
        "tw2": (F // 2, F // 4, 3), "tb2": (F // 4,),
        "tw3": (F // 4, F // 8, 3), "tb3": (F // 8,),
        # Conv1d weights: (C_out, C_in, K)
        "cw1": (A * 4, F // 8, 3), "cb1": (A * 4,),
        "cw2": (A * 2, A * 4, 3), "cb2": (A * 2,),
        "cw3": (A, A * 2, 3), "cb3": (A,),
    }
    fan_in = {
        "tw1": F * 3, "tb1": F * 3, "tw2": (F // 2) * 3, "tb2": (F // 2) * 3,
        "tw3": (F // 4) * 3, "tb3": (F // 4) * 3,
        "cw1": (F // 8) * 3, "cb1": (F // 8) * 3,
        "cw2": (A * 4) * 3, "cb2": (A * 4) * 3,
        "cw3": (A * 2) * 3, "cb3": (A * 2) * 3,
    }
    params = {}
    keys = jax.random.split(key, len(shapes))
    for k_sub, (name, shp) in zip(keys, sorted(shapes.items())):
        bound = 1.0 / jnp.sqrt(float(fan_in[name]))
        params[name] = jax.random.uniform(
            k_sub, shp, jnp.float32, minval=-bound, maxval=bound)
    return params


# ---------------------------------------------------------------------------
# Pure-JAX reference (independent zero-stuffing formulation) for correctness
# ---------------------------------------------------------------------------
def _ref_conv(x_pad, w, b, L_out, act):
    K = w.shape[0]
    acc = sum(jnp.einsum("blc,co->blo", x_pad[:, k:k + L_out, :], w[k])
              for k in range(K)) + b[None, None, :]
    if act == "relu":
        return jnp.maximum(acc, 0.0)
    if act == "tanh":
        return jnp.tanh(acc)
    return acc


def ref_forward(params, x, audio_length):
    def ct(x, w_t, b, act):
        B, L, C_in = x.shape
        L_out = 2 * L - 1
        x_s = jnp.zeros((B, L_out, C_in), x.dtype).at[:, ::2, :].set(x)
        x_pad = jnp.pad(x_s, ((0, 0), (1, 1), (0, 0)))
        w = jnp.transpose(w_t[:, :, ::-1], (2, 0, 1))
        return _ref_conv(x_pad, w, b, L_out, act)

    def cv(x, w_c, b, act):
        x_pad = jnp.pad(x, ((0, 0), (1, 1), (0, 0)))
        w = jnp.transpose(w_c, (2, 1, 0))
        return _ref_conv(x_pad, w, b, x.shape[1], act)

    h = ct(x, params["tw1"], params["tb1"], "relu")
    h = ct(h, params["tw2"], params["tb2"], "relu")
    h = ct(h, params["tw3"], params["tb3"], "relu")
    M = linear_interp_matrix(h.shape[1], audio_length)
    h = jnp.einsum("ol,blc->boc", M, h)
    h = cv(h, params["cw1"], params["cb1"], "relu")
    h = cv(h, params["cw2"], params["cb2"], "relu")
    h = cv(h, params["cw3"], params["cb3"], "tanh")
    return jnp.transpose(h, (0, 2, 1))


# ---------------------------------------------------------------------------
if __name__ == "__main__":
    # Small shapes consistent with the module:
    #   video_length=8, video_feature=32, audio_length=256, audio_feature=1
    B, T, VF, A_LEN, A_FEAT = 2, 8, 32, 256, 1

    key = jax.random.PRNGKey(0)
    k_params, k_x = jax.random.split(key)
    params = init_params(k_params, VF, A_FEAT)
    x = jax.random.normal(k_x, (B, T, VF), jnp.float32)

    prep = prepare_params(params, T, A_LEN, B)       # one-time weight prep
    out = feature2audio_forward(prep, x)
    out = jax.block_until_ready(out)

    assert out.shape == (B, A_FEAT, A_LEN), out.shape

    ref = ref_forward(params, x, A_LEN)
    err = float(jnp.max(jnp.abs(out - ref)))
    assert jnp.allclose(out, ref, atol=2e-3, rtol=2e-3), err

    print("KERNEL_OK")
</pallas_src>

<mosaic_0001>
module attributes {stable_mosaic.version = 11 : i64} {
  func.func @kernel(%arg0: memref<16x32xf32, #tpu.memory_space<vmem>>, %arg1: memref<3x16x32xf32, #tpu.memory_space<vmem>>, %arg2: memref<3x16x30xf32, #tpu.memory_space<vmem>>, %arg3: memref<3x8x16xf32, #tpu.memory_space<vmem>>, %arg4: memref<3x30x58xf32, #tpu.memory_space<vmem>>, %arg5: memref<3x4x8xf32, #tpu.memory_space<vmem>>, %arg6: memref<3x58x114xf32, #tpu.memory_space<vmem>>, %arg7: memref<28x1xf32, #tpu.memory_space<vmem>>, %arg8: memref<114x512xf32, #tpu.memory_space<vmem>>, %arg9: memref<4x13xf32, #tpu.memory_space<vmem>>, %arg10: memref<13x2xf32, #tpu.memory_space<vmem>>, %arg11: memref<7x1xf32, #tpu.memory_space<vmem>>, %arg12: memref<2x1x256xf32, #tpu.memory_space<vmem>>) attributes {dimension_semantics = [], scalar_prefetch = 0 : i64, scratch_operands = 0 : i64, tpu.core_type = #tpu.core_type<tc>} {
    %c0 = arith.constant 0 : index
    %c0_0 = arith.constant 0 : index
    %0 = vector.load %arg7[%c0, %c0_0] : memref<28x1xf32, #tpu.memory_space<vmem>>, vector<16x1xf32>
    %c16 = arith.constant 16 : index
    %c0_1 = arith.constant 0 : index
    %1 = vector.load %arg7[%c16, %c0_1] : memref<28x1xf32, #tpu.memory_space<vmem>>, vector<8x1xf32>
    %c24 = arith.constant 24 : index
    %c0_2 = arith.constant 0 : index
    %2 = vector.load %arg7[%c24, %c0_2] : memref<28x1xf32, #tpu.memory_space<vmem>>, vector<4x1xf32>
    %c0_3 = arith.constant 0 : index
    %c0_4 = arith.constant 0 : index
    %3 = vector.load %arg0[%c0_3, %c0_4] : memref<16x32xf32, #tpu.memory_space<vmem>>, vector<16x32xf32>
    %c0_5 = arith.constant 0 : index
    %c0_6 = arith.constant 0 : index
    %c0_7 = arith.constant 0 : index
    %4 = vector.load %arg1[%c0_5, %c0_6, %c0_7] : memref<3x16x32xf32, #tpu.memory_space<vmem>>, vector<1x16x32xf32>
    %5 = vector.shape_cast %4 : vector<1x16x32xf32> to vector<16x32xf32>
    %cst = arith.constant dense<0.000000e+00> : vector<16x16xf32>
    %6 = tpu.matmul %5, %3, %cst {dimension_numbers = #tpu.dot_dimension_numbers<[1], [1], [0], [0], [0, 0, 1, 0], [], []>} : vector<16x32xf32>, vector<16x32xf32>, vector<16x16xf32> -> vector<16x16xf32>
    %c0_8 = arith.constant 0 : index
    %c0_9 = arith.constant 0 : index
    %c0_10 = arith.constant 0 : index
    %7 = vector.load %arg2[%c0_8, %c0_9, %c0_10] : memref<3x16x30xf32, #tpu.memory_space<vmem>>, vector<1x16x30xf32>
    %8 = vector.shape_cast %7 : vector<1x16x30xf32> to vector<16x30xf32>
    %cst_11 = arith.constant dense<0.000000e+00> : vector<16x30xf32>
    %9 = tpu.matmul %6, %8, %cst_11 {dimension_numbers = #tpu.dot_dimension_numbers<[1], [0], [0], [1], [0, 0, 1, 1], [], []>} : vector<16x16xf32>, vector<16x30xf32>, vector<16x30xf32> -> vector<16x30xf32>
    %c1 = arith.constant 1 : index
    %c0_12 = arith.constant 0 : index
    %c0_13 = arith.constant 0 : index
    %10 = vector.load %arg1[%c1, %c0_12, %c0_13] : memref<3x16x32xf32, #tpu.memory_space<vmem>>, vector<1x16x32xf32>
    %11 = vector.shape_cast %10 : vector<1x16x32xf32> to vector<16x32xf32>
    %cst_14 = arith.constant dense<0.000000e+00> : vector<16x16xf32>
    %12 = tpu.matmul %11, %3, %cst_14 {dimension_numbers = #tpu.dot_dimension_numbers<[1], [1], [0], [0], [0, 0, 1, 0], [], []>} : vector<16x32xf32>, vector<16x32xf32>, vector<16x16xf32> -> vector<16x16xf32>
    %c1_15 = arith.constant 1 : index
    %c0_16 = arith.constant 0 : index
    %c0_17 = arith.constant 0 : index
    %13 = vector.load %arg2[%c1_15, %c0_16, %c0_17] : memref<3x16x30xf32, #tpu.memory_space<vmem>>, vector<1x16x30xf32>
    %14 = vector.shape_cast %13 : vector<1x16x30xf32> to vector<16x30xf32>
    %cst_18 = arith.constant dense<0.000000e+00> : vector<16x30xf32>
    %15 = tpu.matmul %12, %14, %cst_18 {dimension_numbers = #tpu.dot_dimension_numbers<[1], [0], [0], [1], [0, 0, 1, 1], [], []>} : vector<16x16xf32>, vector<16x30xf32>, vector<16x30xf32> -> vector<16x30xf32>
    %16 = arith.addf %9, %15 : vector<16x30xf32>
    %c2 = arith.constant 2 : index
    %c0_19 = arith.constant 0 : index
    %c0_20 = arith.constant 0 : index
    %17 = vector.load %arg1[%c2, %c0_19, %c0_20] : memref<3x16x32xf32, #tpu.memory_space<vmem>>, vector<1x16x32xf32>
    %18 = vector.shape_cast %17 : vector<1x16x32xf32> to vector<16x32xf32>
    %cst_21 = arith.constant dense<0.000000e+00> : vector<16x16xf32>
    %19 = tpu.matmul %18, %3, %cst_21 {dimension_numbers = #tpu.dot_dimension_numbers<[1], [1], [0], [0], [0, 0, 1, 0], [], []>} : vector<16x32xf32>, vector<16x32xf32>, vector<16x16xf32> -> vector<16x16xf32>
    %c2_22 = arith.constant 2 : index
    %c0_23 = arith.constant 0 : index
    %c0_24 = arith.constant 0 : index
    %20 = vector.load %arg2[%c2_22, %c0_23, %c0_24] : memref<3x16x30xf32, #tpu.memory_space<vmem>>, vector<1x16x30xf32>
    %21 = vector.shape_cast %20 : vector<1x16x30xf32> to vector<16x30xf32>
    %cst_25 = arith.constant dense<0.000000e+00> : vector<16x30xf32>
    %22 = tpu.matmul %19, %21, %cst_25 {dimension_numbers = #tpu.dot_dimension_numbers<[1], [0], [0], [1], [0, 0, 1, 1], [], []>} : vector<16x16xf32>, vector<16x30xf32>, vector<16x30xf32> -> vector<16x30xf32>
    %23 = arith.addf %16, %22 : vector<16x30xf32>
    %24 = vector.broadcast %0 : vector<16x1xf32> to vector<16x30xf32>
    %25 = arith.addf %23, %24 : vector<16x30xf32>
    %cst_26 = arith.constant 0.000000e+00 : f32
    %26 = vector.broadcast %cst_26 : f32 to vector<16x30xf32>
    %27 = arith.maximumf %25, %26 : vector<16x30xf32>
    %c0_27 = arith.constant 0 : index
    %c0_28 = arith.constant 0 : index
    %c0_29 = arith.constant 0 : index
    %28 = vector.load %arg3[%c0_27, %c0_28, %c0_29] : memref<3x8x16xf32, #tpu.memory_space<vmem>>, vector<1x8x16xf32>
    %29 = vector.shape_cast %28 : vector<1x8x16xf32> to vector<8x16xf32>
    %cst_30 = arith.constant dense<0.000000e+00> : vector<8x30xf32>
    %30 = tpu.matmul %29, %27, %cst_30 {dimension_numbers = #tpu.dot_dimension_numbers<[1], [0], [0], [1], [0, 0, 1, 1], [], []>} : vector<8x16xf32>, vector<16x30xf32>, vector<8x30xf32> -> vector<8x30xf32>
    %c0_31 = arith.constant 0 : index
    %c0_32 = arith.constant 0 : index
    %c0_33 = arith.constant 0 : index
    %31 = vector.load %arg4[%c0_31, %c0_32, %c0_33] : memref<3x30x58xf32, #tpu.memory_space<vmem>>, vector<1x30x58xf32>
    %32 = vector.shape_cast %31 : vector<1x30x58xf32> to vector<30x58xf32>
    %cst_34 = arith.constant dense<0.000000e+00> : vector<8x58xf32>
    %33 = tpu.matmul %30, %32, %cst_34 {dimension_numbers = #tpu.dot_dimension_numbers<[1], [0], [0], [1], [0, 0, 1, 1], [], []>} : vector<8x30xf32>, vector<30x58xf32>, vector<8x58xf32> -> vector<8x58xf32>
    %c1_35 = arith.constant 1 : index
    %c0_36 = arith.constant 0 : index
    %c0_37 = arith.constant 0 : index
    %34 = vector.load %arg3[%c1_35, %c0_36, %c0_37] : memref<3x8x16xf32, #tpu.memory_space<vmem>>, vector<1x8x16xf32>
    %35 = vector.shape_cast %34 : vector<1x8x16xf32> to vector<8x16xf32>
    %cst_38 = arith.constant dense<0.000000e+00> : vector<8x30xf32>
    %36 = tpu.matmul %35, %27, %cst_38 {dimension_numbers = #tpu.dot_dimension_numbers<[1], [0], [0], [1], [0, 0, 1, 1], [], []>} : vector<8x16xf32>, vector<16x30xf32>, vector<8x30xf32> -> vector<8x30xf32>
    %c1_39 = arith.constant 1 : index
    %c0_40 = arith.constant 0 : index
    %c0_41 = arith.constant 0 : index
    %37 = vector.load %arg4[%c1_39, %c0_40, %c0_41] : memref<3x30x58xf32, #tpu.memory_space<vmem>>, vector<1x30x58xf32>
    %38 = vector.shape_cast %37 : vector<1x30x58xf32> to vector<30x58xf32>
    %cst_42 = arith.constant dense<0.000000e+00> : vector<8x58xf32>
    %39 = tpu.matmul %36, %38, %cst_42 {dimension_numbers = #tpu.dot_dimension_numbers<[1], [0], [0], [1], [0, 0, 1, 1], [], []>} : vector<8x30xf32>, vector<30x58xf32>, vector<8x58xf32> -> vector<8x58xf32>
    %40 = arith.addf %33, %39 : vector<8x58xf32>
    %c2_43 = arith.constant 2 : index
    %c0_44 = arith.constant 0 : index
    %c0_45 = arith.constant 0 : index
    %41 = vector.load %arg3[%c2_43, %c0_44, %c0_45] : memref<3x8x16xf32, #tpu.memory_space<vmem>>, vector<1x8x16xf32>
    %42 = vector.shape_cast %41 : vector<1x8x16xf32> to vector<8x16xf32>
    %cst_46 = arith.constant dense<0.000000e+00> : vector<8x30xf32>
    %43 = tpu.matmul %42, %27, %cst_46 {dimension_numbers = #tpu.dot_dimension_numbers<[1], [0], [0], [1], [0, 0, 1, 1], [], []>} : vector<8x16xf32>, vector<16x30xf32>, vector<8x30xf32> -> vector<8x30xf32>
    %c2_47 = arith.constant 2 : index
    %c0_48 = arith.constant 0 : index
    %c0_49 = arith.constant 0 : index
    %44 = vector.load %arg4[%c2_47, %c0_48, %c0_49] : memref<3x30x58xf32, #tpu.memory_space<vmem>>, vector<1x30x58xf32>
    %45 = vector.shape_cast %44 : vector<1x30x58xf32> to vector<30x58xf32>
    %cst_50 = arith.constant dense<0.000000e+00> : vector<8x58xf32>
    %46 = tpu.matmul %43, %45, %cst_50 {dimension_numbers = #tpu.dot_dimension_numbers<[1], [0], [0], [1], [0, 0, 1, 1], [], []>} : vector<8x30xf32>, vector<30x58xf32>, vector<8x58xf32> -> vector<8x58xf32>
    %47 = arith.addf %40, %46 : vector<8x58xf32>
    %48 = vector.broadcast %1 : vector<8x1xf32> to vector<8x58xf32>
    %49 = arith.addf %47, %48 : vector<8x58xf32>
    %cst_51 = arith.constant 0.000000e+00 : f32
    %50 = vector.broadcast %cst_51 : f32 to vector<8x58xf32>
    %51 = arith.maximumf %49, %50 : vector<8x58xf32>
    %c0_52 = arith.constant 0 : index
    %c0_53 = arith.constant 0 : index
    %c0_54 = arith.constant 0 : index
    %52 = vector.load %arg5[%c0_52, %c0_53, %c0_54] : memref<3x4x8xf32, #tpu.memory_space<vmem>>, vector<1x4x8xf32>
    %53 = vector.shape_cast %52 : vector<1x4x8xf32> to vector<4x8xf32>
    %cst_55 = arith.constant dense<0.000000e+00> : vector<4x58xf32>
    %54 = tpu.matmul %53, %51, %cst_55 {dimension_numbers = #tpu.dot_dimension_numbers<[1], [0], [0], [1], [0, 0, 1, 1], [], []>} : vector<4x8xf32>, vector<8x58xf32>, vector<4x58xf32> -> vector<4x58xf32>
    %c0_56 = arith.constant 0 : index
    %c0_57 = arith.constant 0 : index
    %c0_58 = arith.constant 0 : index
    %55 = vector.load %arg6[%c0_56, %c0_57, %c0_58] : memref<3x58x114xf32, #tpu.memory_space<vmem>>, vector<1x58x114xf32>
    %56 = vector.shape_cast %55 : vector<1x58x114xf32> to vector<58x114xf32>
    %cst_59 = arith.constant dense<0.000000e+00> : vector<4x114xf32>
    %57 = tpu.matmul %54, %56, %cst_59 {dimension_numbers = #tpu.dot_dimension_numbers<[1], [0], [0], [1], [0, 0, 1, 1], [], []>} : vector<4x58xf32>, vector<58x114xf32>, vector<4x114xf32> -> vector<4x114xf32>
    %c1_60 = arith.constant 1 : index
    %c0_61 = arith.constant 0 : index
    %c0_62 = arith.constant 0 : index
    %58 = vector.load %arg5[%c1_60, %c0_61, %c0_62] : memref<3x4x8xf32, #tpu.memory_space<vmem>>, vector<1x4x8xf32>
    %59 = vector.shape_cast %58 : vector<1x4x8xf32> to vector<4x8xf32>
    %cst_63 = arith.constant dense<0.000000e+00> : vector<4x58xf32>
    %60 = tpu.matmul %59, %51, %cst_63 {dimension_numbers = #tpu.dot_dimension_numbers<[1], [0], [0], [1], [0, 0, 1, 1], [], []>} : vector<4x8xf32>, vector<8x58xf32>, vector<4x58xf32> -> vector<4x58xf32>
    %c1_64 = arith.constant 1 : index
    %c0_65 = arith.constant 0 : index
    %c0_66 = arith.constant 0 : index
    %61 = vector.load %arg6[%c1_64, %c0_65, %c0_66] : memref<3x58x114xf32, #tpu.memory_space<vmem>>, vector<1x58x114xf32>
    %62 = vector.shape_cast %61 : vector<1x58x114xf32> to vector<58x114xf32>
    %cst_67 = arith.constant dense<0.000000e+00> : vector<4x114xf32>
    %63 = tpu.matmul %60, %62, %cst_67 {dimension_numbers = #tpu.dot_dimension_numbers<[1], [0], [0], [1], [0, 0, 1, 1], [], []>} : vector<4x58xf32>, vector<58x114xf32>, vector<4x114xf32> -> vector<4x114xf32>
    %64 = arith.addf %57, %63 : vector<4x114xf32>
    %c2_68 = arith.constant 2 : index
    %c0_69 = arith.constant 0 : index
    %c0_70 = arith.constant 0 : index
    %65 = vector.load %arg5[%c2_68, %c0_69, %c0_70] : memref<3x4x8xf32, #tpu.memory_space<vmem>>, vector<1x4x8xf32>
    %66 = vector.shape_cast %65 : vector<1x4x8xf32> to vector<4x8xf32>
    %cst_71 = arith.constant dense<0.000000e+00> : vector<4x58xf32>
    %67 = tpu.matmul %66, %51, %cst_71 {dimension_numbers = #tpu.dot_dimension_numbers<[1], [0], [0], [1], [0, 0, 1, 1], [], []>} : vector<4x8xf32>, vector<8x58xf32>, vector<4x58xf32> -> vector<4x58xf32>
    %c2_72 = arith.constant 2 : index
    %c0_73 = arith.constant 0 : index
    %c0_74 = arith.constant 0 : index
    %68 = vector.load %arg6[%c2_72, %c0_73, %c0_74] : memref<3x58x114xf32, #tpu.memory_space<vmem>>, vector<1x58x114xf32>
    %69 = vector.shape_cast %68 : vector<1x58x114xf32> to vector<58x114xf32>
    %cst_75 = arith.constant dense<0.000000e+00> : vector<4x114xf32>
    %70 = tpu.matmul %67, %69, %cst_75 {dimension_numbers = #tpu.dot_dimension_numbers<[1], [0], [0], [1], [0, 0, 1, 1], [], []>} : vector<4x58xf32>, vector<58x114xf32>, vector<4x114xf32> -> vector<4x114xf32>
    %71 = arith.addf %64, %70 : vector<4x114xf32>
    %72 = vector.broadcast %2 : vector<4x1xf32> to vector<4x114xf32>
    %73 = arith.addf %71, %72 : vector<4x114xf32>
    %cst_76 = arith.constant 0.000000e+00 : f32
    %74 = vector.broadcast %cst_76 : f32 to vector<4x114xf32>
    %75 = arith.maximumf %73, %74 : vector<4x114xf32>
    %c0_77 = arith.constant 0 : index
    %c0_78 = arith.constant 0 : index
    %76 = vector.load %arg8[%c0_77, %c0_78] : memref<114x512xf32, #tpu.memory_space<vmem>>, vector<114x512xf32>
    %cst_79 = arith.constant dense<0.000000e+00> : vector<4x512xf32>
    %77 = tpu.matmul %75, %76, %cst_79 {dimension_numbers = #tpu.dot_dimension_numbers<[1], [0], [0], [1], [0, 0, 1, 1], [], []>} : vector<4x114xf32>, vector<114x512xf32>, vector<4x512xf32> -> vector<4x512xf32>
    %78 = tpu.iota {dimensions = array<i32: 1>} : vector<1x512xi32>
    %c0_i32 = arith.constant 0 : i32
    %79 = vector.broadcast %c0_i32 : i32 to vector<1x512xi32>
    %80 = arith.cmpi eq, %78, %79 : vector<1x512xi32>
    %c255_i32 = arith.constant 255 : i32
    %81 = vector.broadcast %c255_i32 : i32 to vector<1x512xi32>
    %82 = arith.cmpi eq, %78, %81 : vector<1x512xi32>
    %c256_i32 = arith.constant 256 : i32
    %83 = vector.broadcast %c256_i32 : i32 to vector<1x512xi32>
    %84 = arith.cmpi eq, %78, %83 : vector<1x512xi32>
    %85 = arith.ori %80, %84 : vector<1x512xi1>
    %c511_i32 = arith.constant 511 : i32
    %86 = vector.broadcast %c511_i32 : i32 to vector<1x512xi32>
    %87 = arith.cmpi eq, %78, %86 : vector<1x512xi32>
    %88 = arith.ori %82, %87 : vector<1x512xi1>
    %89 = arith.extui %85 : vector<1x512xi1> to vector<1x512xi32>
    %90 = arith.sitofp %89 : vector<1x512xi32> to vector<1x512xf32>
    %cst_80 = arith.constant 1.000000e+00 : f32
    %91 = vector.broadcast %cst_80 : f32 to vector<1x512xf32>
    %92 = arith.subf %91, %90 : vector<1x512xf32>
    %93 = arith.extui %88 : vector<1x512xi1> to vector<1x512xi32>
    %94 = arith.sitofp %93 : vector<1x512xi32> to vector<1x512xf32>
    %cst_81 = arith.constant 1.000000e+00 : f32
    %95 = vector.broadcast %cst_81 : f32 to vector<1x512xf32>
    %96 = arith.subf %95, %94 : vector<1x512xf32>
    %cst_82 = arith.constant 1.000000e+00 : f32
    %97 = vector.broadcast %cst_82 : f32 to vector<1x512xf32>
    %c0_83 = arith.constant 0 : index
    %c0_84 = arith.constant 0 : index
    %98 = vector.load %arg9[%c0_83, %c0_84] : memref<4x13xf32, #tpu.memory_space<vmem>>, vector<4x13xf32>
    %c1_i32 = arith.constant 1 : i32
    %99 = tpu.dynamic_rotate %77 by %c1_i32 dim 1 : vector<4x512xf32>, i32 -> vector<4x512xf32>
    %100 = vector.broadcast %92 : vector<1x512xf32> to vector<4x512xf32>
    %101 = arith.mulf %99, %100 : vector<4x512xf32>
    %c511_i32_85 = arith.constant 511 : i32
    %102 = tpu.dynamic_rotate %77 by %c511_i32_85 dim 1 : vector<4x512xf32>, i32 -> vector<4x512xf32>
    %103 = vector.broadcast %96 : vector<1x512xf32> to vector<4x512xf32>
    %104 = arith.mulf %102, %103 : vector<4x512xf32>
    %105 = tpu.concatenate %101, %77, %104, %97 in 0 : vector<4x512xf32>, vector<4x512xf32>, vector<4x512xf32>, vector<1x512xf32> -> vector<13x512xf32>
    %cst_86 = arith.constant dense<0.000000e+00> : vector<4x512xf32>
    %106 = tpu.matmul %98, %105, %cst_86 {dimension_numbers = #tpu.dot_dimension_numbers<[1], [0], [0], [1], [0, 0, 1, 1], [], []>} : vector<4x13xf32>, vector<13x512xf32>, vector<4x512xf32> -> vector<4x512xf32>
    %cst_87 = arith.constant 0.000000e+00 : f32
    %107 = vector.broadcast %cst_87 : f32 to vector<4x512xf32>
    %108 = arith.maximumf %106, %107 : vector<4x512xf32>
    %c0_88 = arith.constant 0 : index
    %c0_89 = arith.constant 0 : index
    %109 = vector.load %arg10[%c0_88, %c0_89] : memref<13x2xf32, #tpu.memory_space<vmem>>, vector<13x2xf32>
    %c1_i32_90 = arith.constant 1 : i32
    %110 = tpu.dynamic_rotate %108 by %c1_i32_90 dim 1 : vector<4x512xf32>, i32 -> vector<4x512xf32>
    %111 = vector.broadcast %92 : vector<1x512xf32> to vector<4x512xf32>
    %112 = arith.mulf %110, %111 : vector<4x512xf32>
    %c511_i32_91 = arith.constant 511 : i32
    %113 = tpu.dynamic_rotate %108 by %c511_i32_91 dim 1 : vector<4x512xf32>, i32 -> vector<4x512xf32>
    %114 = vector.broadcast %96 : vector<1x512xf32> to vector<4x512xf32>
    %115 = arith.mulf %113, %114 : vector<4x512xf32>
    %116 = tpu.concatenate %112, %108, %115, %97 in 0 : vector<4x512xf32>, vector<4x512xf32>, vector<4x512xf32>, vector<1x512xf32> -> vector<13x512xf32>
    %117 = vector.extract_strided_slice %109 {offsets = [0, 0], sizes = [13, 1], strides = [1, 1]} : vector<13x2xf32> to vector<13x1xf32>
    %118 = vector.broadcast %117 : vector<13x1xf32> to vector<13x512xf32>
    %119 = arith.mulf %118, %116 : vector<13x512xf32>
    %cst_92 = arith.constant dense<0.000000e+00> : vector<512xf32>
    %120 = vector.multi_reduction <add>, %119, %cst_92 [0] : vector<13x512xf32> to vector<512xf32>
    %121 = vector.shape_cast %120 : vector<512xf32> to vector<1x512xf32>
    %122 = vector.extract_strided_slice %109 {offsets = [0, 1], sizes = [13, 1], strides = [1, 1]} : vector<13x2xf32> to vector<13x1xf32>
    %123 = vector.broadcast %122 : vector<13x1xf32> to vector<13x512xf32>
    %124 = arith.mulf %123, %116 : vector<13x512xf32>
    %cst_93 = arith.constant dense<0.000000e+00> : vector<512xf32>
    %125 = vector.multi_reduction <add>, %124, %cst_93 [0] : vector<13x512xf32> to vector<512xf32>
    %126 = vector.shape_cast %125 : vector<512xf32> to vector<1x512xf32>
    %127 = tpu.concatenate %121, %126 in 0 : vector<1x512xf32>, vector<1x512xf32> -> vector<2x512xf32>
    %cst_94 = arith.constant 0.000000e+00 : f32
    %128 = vector.broadcast %cst_94 : f32 to vector<2x512xf32>
    %129 = arith.maximumf %127, %128 : vector<2x512xf32>
    %c0_95 = arith.constant 0 : index
    %c0_96 = arith.constant 0 : index
    %130 = vector.load %arg11[%c0_95, %c0_96] : memref<7x1xf32, #tpu.memory_space<vmem>>, vector<7x1xf32>
    %c1_i32_97 = arith.constant 1 : i32
    %131 = tpu.dynamic_rotate %129 by %c1_i32_97 dim 1 : vector<2x512xf32>, i32 -> vector<2x512xf32>
    %132 = vector.broadcast %92 : vector<1x512xf32> to vector<2x512xf32>
    %133 = arith.mulf %131, %132 : vector<2x512xf32>
    %c511_i32_98 = arith.constant 511 : i32
    %134 = tpu.dynamic_rotate %129 by %c511_i32_98 dim 1 : vector<2x512xf32>, i32 -> vector<2x512xf32>
    %135 = vector.broadcast %96 : vector<1x512xf32> to vector<2x512xf32>
    %136 = arith.mulf %134, %135 : vector<2x512xf32>
    %137 = tpu.concatenate %133, %129, %136, %97 in 0 : vector<2x512xf32>, vector<2x512xf32>, vector<2x512xf32>, vector<1x512xf32> -> vector<7x512xf32>
    %138 = vector.broadcast %130 : vector<7x1xf32> to vector<7x512xf32>
    %139 = arith.mulf %138, %137 : vector<7x512xf32>
    %cst_99 = arith.constant dense<0.000000e+00> : vector<512xf32>
    %140 = vector.multi_reduction <add>, %139, %cst_99 [0] : vector<7x512xf32> to vector<512xf32>
    %141 = vector.shape_cast %140 : vector<512xf32> to vector<1x512xf32>
    %142 = math.tanh %141 : vector<1x512xf32>
    %143 = vector.extract_strided_slice %142 {offsets = [0, 0], sizes = [1, 256], strides = [1, 1]} : vector<1x512xf32> to vector<1x256xf32>
    %c0_100 = arith.constant 0 : index
    %c0_101 = arith.constant 0 : index
    %c0_102 = arith.constant 0 : index
    %144 = vector.load %arg12[%c0_100, %c0_101, %c0_102] : memref<2x1x256xf32, #tpu.memory_space<vmem>>, vector<1x1x256xf32>
    %145 = vector.shape_cast %144 : vector<1x1x256xf32> to vector<1x256xf32>
    %146 = vector.shape_cast %143 : vector<1x256xf32> to vector<1x1x256xf32>
    tpu.vector_store %arg12[%c0_100, %c0_101, %c0_102], %146 {strides = array<i32>} : memref<2x1x256xf32, #tpu.memory_space<vmem>>, vector<1x1x256xf32>,
    %147 = vector.extract_strided_slice %142 {offsets = [0, 256], sizes = [1, 256], strides = [1, 1]} : vector<1x512xf32> to vector<1x256xf32>
    %c1_103 = arith.constant 1 : index
    %c0_104 = arith.constant 0 : index
    %c0_105 = arith.constant 0 : index
    %148 = vector.load %arg12[%c1_103, %c0_104, %c0_105] : memref<2x1x256xf32, #tpu.memory_space<vmem>>, vector<1x1x256xf32>
    %149 = vector.shape_cast %148 : vector<1x1x256xf32> to vector<1x256xf32>
    %150 = vector.shape_cast %147 : vector<1x256xf32> to vector<1x1x256xf32>
    tpu.vector_store %arg12[%c1_103, %c0_104, %c0_105], %150 {strides = array<i32>} : memref<2x1x256xf32, #tpu.memory_space<vmem>>, vector<1x1x256xf32>,
    return
  }
}

</mosaic_0001>

<bundles_post_ra>
// kernel: tpu_custom_call.1
= control target key start
LH: loop header
LB: loop body
LE: loop exit
PB: predicated region body
PF: predicated region fallthrough
CT: control target
= control target key end

     0   :  { %17 = vsyncpa [#allocation3], 0  ;;  %s3702_s0 = inlined_call_operand.hbm [shape: f32[16,32], index: 0, kind: input, shape index: {}]   ;;  %s3703_s1 = inlined_call_operand.vmem [shape: f32[3,16,32], index: 1, kind: input, shape index: {}]   ;;  %s3704_s2 = inlined_call_operand.hbm [shape: f32[3,16,30], index: 2, kind: input, shape index: {}]   ;;  %s3705_s3 = inlined_call_operand.hbm [shape: f32[3,8,16], index: 3, kind: input, shape index: {}]   ;;  %s3706_s4 = inlined_call_operand.hbm [shape: f32[3,30,58], index: 4, kind: input, shape index: {}]   ;;  %s3707_s5 = inlined_call_operand.vmem [shape: f32[3,4,8], index: 5, kind: input, shape index: {}]   ;;  %s3708_s6 = inlined_call_operand.hbm [shape: f32[3,58,114], index: 6, kind: input, shape index: {}]   ;;  %s3709_s7 = inlined_call_operand.vmem [shape: f32[28,1], index: 7, kind: input, shape index: {}]   ;;  %s3710_s8 = inlined_call_operand.hbm [shape: f32[114,512], index: 8, kind: input, shape index: {}]   ;;  %s3711_s9 = inlined_call_operand.vmem [shape: f32[4,13], index: 9, kind: input, shape index: {}]   ;;  %s3712_s10 = inlined_call_operand.vmem [shape: f32[13,2], index: 10, kind: input, shape index: {}]   ;;  %s3713_s11 = inlined_call_operand.vmem [shape: f32[7,1], index: 11, kind: input, shape index: {}]   ;;  %s3714_s12 = inlined_call_operand.hbm [shape: f32[2,1,256], index: 12, kind: output, shape index: {}]  }
   0x1   :  { %18 = vsyncpa [#allocation6], 0 }
   0x2   :  { %19 = vsyncpa [#allocation9], 0 }
   0x3   :  { %20 = vsyncpa [#allocation12], 0 }
   0x4   :  { %21 = vsyncpa [#allocation4], 0  ;;  %s3120_s21 = smov [#allocation5]   ;;  %s3121_s23 = smov [#allocation8]  }
   0x5   :  { %s41_s22 = sshll.u32 %s3120_s21, 4  ;;  %s65_s24 = sshll.u32 %s3121_s23, 4  ;;  %s42_s22 = int_to_ptr.vmem [resolvable:$true] %s41_s22  ;;  %s3206_s24 = int_to_ptr.vmem [resolvable:$true] %s65_s24 }
   0x6   :  { %s2956_s27 = scalar_lea.hbm %s3704_s2, 768 }
   0x7   :  { %p2957_p0 = scmp.ne.s32.totalorder %s3704_s2, %s2956_s27  ;;  %p2960_p1 = scmp.lt.u32.totalorder %s2956_s27, %s3704_s2 }
   0x9   :  { %p2962_p2 = pnand %p2960_p1, %p2957_p0 }
   0xb   :  { %2965 = shalt.err (!%p2962_p2)
}
   0xc   :  { %s2966_s14 = scalar_lea.vmem %s42_s22, 768  ;;  %p2971_p4 = scmp.lt.s32.totalorder %s42_s22, %s42_s22 }
   0xd   :  { %p2967_p3 = scmp.ne.s32.totalorder %s42_s22, %s2966_s14  ;;  %p2972_p5 = scmp.lt.s32.totalorder %s2966_s14, %s2966_s14 }
   0xf   :  { %p2973_p6 = por %p2972_p5, %p2971_p4 }
  0x11   :  { %p2974_p7 = pnand %p2973_p6, %p2967_p3 }
  0x13   :  { %2977 = shalt.err (!%p2974_p7)
}
  0x14   :  { %s3122_s15 = smov 128   ;;  %s3123_s16 = smov 8  }
  0x15   :  { %47 = dma.hbm_to_vmem [thread:$0]  %s3704_s2, 768, %s42_s22, [#allocation6], %s3122_s15, %s3122_s15, %s3123_s16  }
  0x16   :  { %s2978_s21 = scalar_lea.hbm %s3706_s4, 1536 }
  0x17   :  { %p2979_p8 = scmp.ne.s32.totalorder %s3706_s4, %s2978_s21  ;;  %p2982_p9 = scmp.lt.u32.totalorder %s2978_s21, %s3706_s4 }
  0x19   :  { %p2984_p10 = pnand %p2982_p9, %p2979_p8 }
  0x1b   :  { %2987 = shalt.err (!%p2984_p10)
}
  0x1c   :  { %s2988_s28 = scalar_lea.vmem %s3206_s24, 1536  ;;  %p2993_p12 = scmp.lt.s32.totalorder %s3206_s24, %s3206_s24 }
  0x1d   :  { %p2989_p11 = scmp.ne.s32.totalorder %s3206_s24, %s2988_s28  ;;  %p2994_p13 = scmp.lt.s32.totalorder %s2988_s28, %s2988_s28 }
  0x1f   :  { %p2995_p0 = por %p2994_p13, %p2993_p12 }
  0x21   :  { %p2996_p1 = pnand %p2995_p0, %p2989_p11 }
  0x23   :  { %2999 = shalt.err (!%p2996_p1)
}
  0x24   :  { %71 = dma.hbm_to_vmem [thread:$0]  %s3706_s4, 1536, %s3206_s24, [#allocation9], %s3122_s15, %s3122_s15, %s3123_s16  }
  0x25   :  { %s3124_s29 = smov [#allocation2]   ;;  %s3125_s13 = smov [#allocation7]  }
  0x26   :  { %s27_s30 = sshll.u32 %s3124_s29, 4  ;;  %s53_s14 = sshll.u32 %s3125_s13, 4  ;;  %s28_s30 = int_to_ptr.vmem [resolvable:$true] %s27_s30  ;;  %s3243_s14 = int_to_ptr.vmem [resolvable:$true] %s53_s14 }
  0x27   :  { %s3000_s19 = scalar_lea.hbm %s3702_s0, 256 }
  0x28   :  { %p3001_p2 = scmp.ne.s32.totalorder %s3702_s0, %s3000_s19  ;;  %p3004_p3 = scmp.lt.u32.totalorder %s3000_s19, %s3702_s0 }
  0x2a   :  { %p3006_p4 = pnand %p3004_p3, %p3001_p2 }
  0x2c   :  { %3009 = shalt.err (!%p3006_p4)
}
  0x2d   :  { %s3010_s4 = scalar_lea.vmem %s28_s30, 256  ;;  %p3015_p6 = scmp.lt.s32.totalorder %s28_s30, %s28_s30 }
  0x2e   :  { %p3011_p5 = scmp.ne.s32.totalorder %s28_s30, %s3010_s4  ;;  %p3016_p7 = scmp.lt.s32.totalorder %s3010_s4, %s3010_s4 }
  0x30   :  { %p3017_p8 = por %p3016_p7, %p3015_p6 }
  0x32   :  { %p3018_p9 = pnand %p3017_p8, %p3011_p5 }
  0x34   :  { %3021 = shalt.err (!%p3018_p9)
}
  0x35   :  { %33 = dma.hbm_to_vmem [thread:$0]  %s3702_s0, 256, %s28_s30, [#allocation3], %s3122_s15, %s3122_s15, %s3123_s16  }
  0x36   :  { %s3022_s2 = scalar_lea.hbm %s3705_s3, 384 }
  0x37   :  { %p3023_p10 = scmp.ne.s32.totalorder %s3705_s3, %s3022_s2  ;;  %p3026_p11 = scmp.lt.u32.totalorder %s3022_s2, %s3705_s3 }
  0x39   :  { %p3028_p12 = pnand %p3026_p11, %p3023_p10 }
  0x3b   :  { %3031 = shalt.err (!%p3028_p12)
}
  0x3c   :  { %s3032_s18 = scalar_lea.vmem %s3243_s14, 384  ;;  %p3037_p0 = scmp.lt.s32.totalorder %s3243_s14, %s3243_s14 }
  0x3d   :  { %p3033_p13 = scmp.ne.s32.totalorder %s3243_s14, %s3032_s18  ;;  %p3038_p1 = scmp.lt.s32.totalorder %s3032_s18, %s3032_s18 }
  0x3f   :  { %p3039_p2 = por %p3038_p1, %p3037_p0 }
  0x41   :  { %p3040_p3 = pnand %p3039_p2, %p3033_p13 }
  0x43   :  { %3043 = shalt.err (!%p3040_p3)
}
  0x44   :  { %59 = dma.hbm_to_vmem [thread:$0]  %s3705_s3, 384, %s3243_s14, [#allocation6], %s3122_s15, %s3122_s15, %s3123_s16  }
  0x45   :  { %s3126_s19 = smov [#allocation10]   ;;  %s3127_s21 = smov [#allocation11]  }
  0x46   :  { %s79_s20 = sshll.u32 %s3126_s19, 4  ;;  %s93_s23 = sshll.u32 %s3127_s21, 4  ;;  %s80_s20 = int_to_ptr.vmem [resolvable:$true] %s79_s20  ;;  %s3280_s23 = int_to_ptr.vmem [resolvable:$true] %s93_s23 }
  0x47   :  { %s3044_s24 = scalar_lea.hbm %s3708_s6, 3072 }
  0x48   :  { %p3045_p4 = scmp.ne.s32.totalorder %s3708_s6, %s3044_s24  ;;  %p3048_p5 = scmp.lt.u32.totalorder %s3044_s24, %s3708_s6 }
  0x4a   :  { %p3050_p6 = pnand %p3048_p5, %p3045_p4 }
  0x4c   :  { %3053 = shalt.err (!%p3050_p6)
}
  0x4d   :  { %s3054_s3 = scalar_lea.vmem %s80_s20, 3072  ;;  %p3059_p8 = scmp.lt.s32.totalorder %s80_s20, %s80_s20 }
  0x4e   :  { %p3055_p7 = scmp.ne.s32.totalorder %s80_s20, %s3054_s3  ;;  %p3060_p9 = scmp.lt.s32.totalorder %s3054_s3, %s3054_s3 }
  0x50   :  { %p3061_p10 = por %p3060_p9, %p3059_p8 }
  0x52   :  { %p3062_p11 = pnand %p3061_p10, %p3055_p7 }
  0x54   :  { %3065 = shalt.err (!%p3062_p11)
}
  0x55   :  { %85 = dma.hbm_to_vmem [thread:$0]  %s3708_s6, 3072, %s80_s20, [#allocation9], %s3122_s15, %s3122_s15, %s3123_s16  }
  0x56   :  { %s3066_s17 = scalar_lea.hbm %s3710_s8, 7680 }
  0x57   :  { %p3067_p12 = scmp.ne.s32.totalorder %s3710_s8, %s3066_s17  ;;  %p3070_p13 = scmp.lt.u32.totalorder %s3066_s17, %s3710_s8 }
  0x59   :  { %p3072_p0 = pnand %p3070_p13, %p3067_p12 }
  0x5b   :  { %3075 = shalt.err (!%p3072_p0)
}
  0x5c   :  { %s3076_s21 = scalar_lea.vmem %s3280_s23, 7680  ;;  %p3081_p2 = scmp.lt.s32.totalorder %s3280_s23, %s3280_s23 }
  0x5d   :  { %p3077_p1 = scmp.ne.s32.totalorder %s3280_s23, %s3076_s21  ;;  %p3082_p3 = scmp.lt.s32.totalorder %s3076_s21, %s3076_s21 }
  0x5f   :  { %p3083_p4 = por %p3082_p3, %p3081_p2 }
  0x61   :  { %p3084_p5 = pnand %p3083_p4, %p3077_p1 }
  0x63   :  { %3087 = shalt.err (!%p3084_p5)
}
  0x64   :  { %s3128_s6 = smov 512   ;;  %s3129_s15 = smov 32  }
  0x65   :  { %99 = dma.hbm_to_vmem [thread:$0]  %s3710_s8, 7680, %s3280_s23, [#allocation12], %s3128_s6, %s3128_s6, %s3129_s15  }
  0x66   :  { %3110 = dma.done.wait [#allocation3], 256  }
  0x67   :  { %3111 = vsyncadd [#allocation3], 4294967040 }
  0x68   :  { %3112 = dma.done.wait [#allocation6], 1152  }
  0x69   :  { %3113 = vsyncadd [#allocation6], 4294966144 }
  0x6a   :  { %3114 = dma.done.wait [#allocation9], 4608  }
  0x6b   :  { %3115 = vsyncadd [#allocation9], 4294962688 }
  0x6c   :  { %3116 = dma.done.wait [#allocation12], 7680  }
  0x6d   :  { %3117 = vsyncadd [#allocation12], 4294959616  ;;  %vm132_vm0 = vcmask 261120   ;;  %v128_v1 = vld [vmem:[#allocation2] sm:$0xff]  ;;  %v129_v2 = vld [vmem:[#allocation2 + $0x8] sm:$0xff]  ;;  %v3130_v17 = vmov 0  }
  0x6e   :  { %vm3317_vm1 = vmpackc.low %vm132_vm0, %vm132_vm0  ;;  %v2450_v3 = vld [vmem:[%s3703_s1 + $0x10] sm:$0xff]  ;;  %v2753_v4 = vpack.c.bf16 %v129_v2, %v128_v1  ;;  %v130_v5 = vld [vmem:[%s3703_s1] sm:$0xff]  ;;  %2945 = vset.pattern.permute.xlu0 %v3130_v17  ;;  %2946 = vset.pattern.permute.xlu1 %v3130_v17  ;;  %vm309_vm2 = vcmask 130048   ;;  %v3131_v28 = vmov 0.0|0.0   ;;  %vm3132_vm3 = vmmov 0   ;;  %s3136_s4 = smov 127  }
  0x6f   :  { %2596 = vmatprep.mubr.msk.f32.mxu1 %vm132_vm0, %v2450_v3  ;;  %2589 = vmatprep.mubr.msk.f32.mxu0 %vm132_vm0, %v130_v5  ;;  %v307_v6 = vld [vmem:[#allocation5 + $0x10] sm:$0xff]  ;;  %v308_v7 = vld [vmem:[#allocation5 + $0x18] sm:$0xff]  ;;  %v2451_v9 = vld [vmem:[%s3703_s1 + $0x18] sm:$0xff]  ;;  %v3133_v29 = vmov 0.0   ;;  %vm818_vm4 = vcmask 1045504   ;;  %vm3134_vm5 = vmmov 1  }
  0x70   :  { %2761 = vmatprep.subr.msk.bf16.mxu1 %vm3317_vm1, %v2753_v4  ;;  %2755 = vmatprep.subr.msk.bf16.mxu0 %vm3317_vm1, %v2753_v4  ;;  %v2765_v8 = vpack.c.bf16 %v308_v7, %v307_v6  ;;  %v131_v10 = vld [vmem:[%s3703_s1 + $0x8] sm:$0xff]  ;;  %v2460_v11 = vld [vmem:[%s3703_s1 + $0x20] sm:$0xff]  ;;  %v220_v13 = vld [vmem:[#allocation5] sm:$0xff]  ;;  %vm814_vm7 = vcmask 244736   ;;  %vm1133_vm8 = vcmask 64512   ;;  %vm1303_vm9 = vcmask 1041408  }
  0x71   :  { %2764 = vmatpush3.bf16.xpose.msk.msra.mxu1 %vm3317_vm1, %v2753_v4  ;;  %2758 = vmatpush3.bf16.xpose.msk.msra.mxu0 %vm3317_vm1, %v2753_v4  ;;  %v2461_v12 = vld [vmem:[%s3703_s1 + $0x28] sm:$0xff]  ;;  %v221_v14 = vld [vmem:[#allocation5 + $0x8] sm:$0xff]  ;;  %v124_v16 = vld [vmem:[%s3709_s7] sm:$0xff]  ;;  %vm1299_vm11 = vcmask 474112   ;;  %vm1681_vm12 = vcmask 932864  }
  0x72   :  { %2775 = vmatprep.subr.msk.bf16.mxu1 %vm3317_vm1, %v2753_v4  ;;  %2766 = vmatprep.subr.bf16.mxu0 %v2765_v8  ;;  %v2769_v15 = vpack.c.bf16 %v221_v14, %v220_v13  ;;  %v125_v18 = vld [vmem:[%s3709_s7 + $0x8] sm:$0xff]  ;;  %v557_v19 = vld [vmem:[#allocation5 + $0x20] sm:$0xff]  ;;  %v558_v20 = vld [vmem:[#allocation5 + $0x28] sm:$0xff] }
  0x73   :  { %644 = vperm.xlu0 %2945, %v124_v16   ;;  %v2779_v25 = vpack.c.bf16 %v558_v20, %v557_v19  ;;  %v810_v38 = vld [vmem:[#allocation8 + $0x20] sm:$0xff]  ;;  %v811_v39 = vld [vmem:[#allocation8 + $0x28] sm:$0xff]  ;;  %v735_v44 = vld [vmem:[#allocation7 + $0x8] sm:$0xff] }
  0x74   :  { %v730_v40 = vld [vmem:[#allocation8] sm:$0xff]  ;;  %v731_v41 = vld [vmem:[#allocation8 + $0x8] sm:$0xff]  ;;  %v2790_v45 = vpack.c.bf16 %v811_v39, %v810_v38  ;;  %v812_v47 = vld [vmem:[#allocation8 + $0x30] sm:$0xff] }
  0x75   :  { %v656_v43 = vld [vmem:[#allocation7] sm:$0xff]  ;;  %v2797_v46 = vpack.c.bf16 %v731_v41, %v730_v40  ;;  %v813_v48 = vld [vmem:[#allocation8 + $0x38] sm:$0x3f]  ;;  %v732_v49 = vld [vmem:[#allocation8 + $0x10] sm:$0xff] }
  0x76   :  { %v733_v50 = vld [vmem:[#allocation8 + $0x18] sm:$0x3f]  ;;  %v2793_v51 = vpack.c.bf16 %v813_v48, %v812_v47  ;;  %vm3382_vm6 = vmpackc.low %vm818_vm4, %vm3134_vm5  ;;  %v1044_v54 = vld [vmem:[#allocation8 + $0x40] sm:$0xff] }
  0x77   :  { %649 = vperm.xlu0 %2945, %v125_v18   ;;  %v2800_v52 = vpack.c.bf16 %v733_v50, %v732_v49  ;;  %v1045_v55 = vld [vmem:[#allocation8 + $0x48] sm:$0xff]  ;;  %v969_v61 = vld [vmem:[#allocation7 + $0x10] sm:$0xff]  ;;  %v1046_v62 = vld [vmem:[#allocation8 + $0x50] sm:$0xff] }
  0x78   :  { %2597 = vmatmul.mubr.msk.f32.vlgmr.msra.gmra.mrb[0].mxu1 %vm132_vm0, %v2451_v9  ;;  %2590 = vmatmul.mubr.msk.f32.vlgmr.msra.gmra.mrb[0].mxu0 %vm132_vm0, %v131_v10  ;;  %v2807_v56 = vpack.c.bf16 %v1045_v55, %v1044_v54  ;;  %v1047_v63 = vld [vmem:[#allocation8 + $0x58] sm:$0x3f]  ;;  %v127_v2 = vld [vmem:[%s3709_s7 + $0x18] sm:$0xf]  ;;  %v1293_v13 = vld [vmem:[#allocation10 + $0x50] sm:$0xff] }
  0x79   :  { %2778 = vmatpush3.bf16.xpose.msk.msra.mxu1 %vm3317_vm1, %v2753_v4  ;;  %2617 = vmatprep.mubr.msk.f32.mxu1 %vm132_vm0, %v2460_v11  ;;  %v2810_v0 = vpack.c.bf16 %v1047_v63, %v1046_v62  ;;  %v126_v1 = vld [vmem:[%s3709_s7 + $0x10] sm:$0xff]  ;;  %v1291_v10 = vld [vmem:[#allocation10 + $0x40] sm:$0xff]  ;;  %v1292_v11 = vld [vmem:[#allocation10 + $0x48] sm:$0xff] }
  0x7a   :  { %2768 = vmatpush3.bf16.msra.mxu0 %v2765_v8  ;;  %2783 = vmatprep.subr.bf16.mxu1 %v3131_v28  ;;  %v1294_v14 = vld [vmem:[#allocation10 + $0x58] sm:$0xff]  ;;  %v1295_v16 = vld [vmem:[#allocation10 + $0x60] sm:$0xff]  ;;  %v1296_v17 = vld [vmem:[#allocation10 + $0x68] sm:$0xff] }
  0x7b   :  { %2770 = vmatprep.subr.bf16.mxu0 %v2769_v15  ;;  %1127 = vperm.xlu1 %2946, %v126_v1   ;;  %v2820_v18 = vpack.c.bf16 %v1296_v17, %v1295_v16  ;;  %v1213_v38 = vld [vmem:[#allocation10 + $0x30] sm:$0xff]  ;;  %v1214_v39 = vld [vmem:[#allocation10 + $0x38] sm:$0x3]  ;;  %vm3442_vm10 = vmpackc.low %vm1303_vm9, %vm3134_vm5 }
  0x7c   :  { %v2836_v40 = vpack.c.bf16 %v1214_v39, %v1213_v38  ;;  %v1531_v49 = vld [vmem:[#allocation10 + $0x90] sm:$0xff]  ;;  %v1532_v50 = vld [vmem:[#allocation10 + $0x98] sm:$0xff]  ;;  %v1622_v62 = vld [vmem:[#allocation11 + $0x8] sm:$0xff] }
  0x7d   :  { %v2484_v55 = vld [vmem:[%s3707_s5 + $0x8] sm:$0xf]  ;;  %v1626_v63 = vld [vmem:[#allocation11 + $0x28] sm:$0xff]  ;;  %v1641_v16 = vld [vmem:[#allocation11 + $0xa0] sm:$0xff] }
  0x7e   :  { %v2852_v1 = vpack.c.bf16 %v1626_v63, %v1622_v62  ;;  %v1627_v41 = vld [vmem:[#allocation11 + $0x30] sm:$0xff] }
  0x7f   :  { %1616 = vperm.xlu1 %2946, %v127_v2   ;;  %v1628_v2 = vld [vmem:[#allocation11 + $0x38] sm:$0xff]  ;;  %v1647_v63 = vld [vmem:[#allocation11 + $0xd0] sm:$0xff] }
  0x80   :  { %2618 = vmatmul.mubr.msk.f32.vlgmr.msra.gmra.mrb[2].mxu1 %vm132_vm0, %v2461_v12  ;;  %v2814_v12 = vpack.c.bf16 %v1292_v11, %v1291_v10  ;;  %v1633_v10 = vld [vmem:[#allocation11 + $0x60] sm:$0xff] }
  0x81   :  { %2631 = vmatprep.mubr.msk.f32.mxu1 %vm3132_vm3, %v3133_v29 }
  0xf2   :  { %v645_v30 = vpop.permute.xlu0 %644 }
  0xf6   :  { %v650_v31 = vpop.permute.xlu0 %649 }
 0x14b   :  { %v2598_v21 = vpop.f32.mrb[0].mxu1  ;;  %v2591_v22 = vpop.f32.mrb[0].mxu0 }
 0x14c   :  { %v297_v23 = vpop.f32.mrb[1].mxu1  ;;  %v211_v24 = vpop.f32.mrb[1].mxu0 }
 0x14d   :  { %2603 = vmatprep.mubr.msk.f32.mxu0 %vm309_vm2, %v297_v23 }
 0x14e   :  { %2604 = vmatmul.mubr.msk.f32.vlgmr.msra.gmra.mrb[2].mxu0 %vm309_vm2, %v2598_v21 }
 0x14f   :  { %2772 = vmatpush3.bf16.msra.mxu0 %v2769_v15  ;;  %2610 = vmatprep.mubr.msk.f32.mxu0 %vm309_vm2, %v211_v24  ;;  %v2817_v15 = vpack.c.bf16 %v1294_v14, %v1293_v13  ;;  %v1642_v13 = vld [vmem:[#allocation11 + $0xa8] sm:$0xff] }
 0x150   :  { %2780 = vmatprep.subr.bf16.mxu0 %v2779_v25 }
 0x153   :  { %v2619_v26 = vpop.f32.mrb[2].mxu1 }
 0x154   :  { %v547_v27 = vpop.f32.mrb[3].mxu1 }
 0x156   :  { %2611 = vmatmul.mubr.msk.f32.vlgmr.msra.gmra.mrb[2].mxu0 %vm309_vm2, %v2591_v22  ;;  %v1128_v22 = vpop.permute.xlu1 %1127 }
 0x157   :  { %2782 = vmatpush3.bf16.msra.mxu0 %v2779_v25  ;;  %2624 = vmatprep.mubr.msk.f32.mxu0 %vm309_vm2, %v547_v27  ;;  %v1132_v25 = vld [vmem:[%s3707_s5] sm:$0xf] }
 0x158   :  { %2786 = vmatprep.subr.bf16.mxu0 %v3131_v28  ;;  %v1208_v27 = vld [vmem:[#allocation10 + $0x8] sm:$0xff] }
 0x15e   :  { %2625 = vmatmul.mubr.msk.f32.vlgmr.msra.gmra.mrb[2].mxu0 %vm309_vm2, %v2619_v26  ;;  %v1207_v26 = vld [vmem:[#allocation10] sm:$0xff] }
 0x15f   :  { %2638 = vmatprep.mubr.msk.f32.mxu0 %vm3132_vm3, %v3133_v29 }
 0x231   :  { %v2626_v32 = vpop.f32.mrb[2].mxu0 }
 0x232   :  { %v653_v33 = vadd.f32 %v2626_v32, %v650_v31  ;;  %v631_v34 = vpop.f32.mrb[3].mxu0  ;;  %v2827_v31 = vpack.c.bf16 %v1208_v27, %v1207_v26  ;;  %v1209_v32 = vld [vmem:[#allocation10 + $0x10] sm:$0xff]  ;;  %v1653_v27 = vld [vmem:[#allocation11 + $0x100] sm:$0xff] }
 0x233   :  { %v652_v35 = vadd.f32 %v645_v30, %v631_v34  ;;  %v2478_v30 = vld [vmem:[%s3707_s5 + $0x4] sm:$0xf]  ;;  %s3135_s5 = smov 1  }
 0x234   :  { %v655_v36 = vmax.f32 %v653_v33, 0.0  ;;  %v1210_v33 = vld [vmem:[#allocation10 + $0x18] sm:$0xff] }
 0x235   :  { %v654_v37 = vmax.f32 %v652_v35, 0.0  ;;  %v2830_v34 = vpack.c.bf16 %v1210_v33, %v1209_v32  ;;  %v1211_v35 = vld [vmem:[#allocation10 + $0x20] sm:$0xff]  ;;  %v1662_v32 = vld [vmem:[#allocation11 + $0x148] sm:$0xff] }
 0x236   :  { %v1666_v33 = vld [vmem:[#allocation11 + $0x168] sm:$0xff] }
 0x237   :  { %v2784_v42 = vpack.c.bf16 %v655_v36, %v654_v37  ;;  %v1212_v36 = vld [vmem:[#allocation10 + $0x28] sm:$0xff] }
 0x238   :  { %v2833_v37 = vpack.c.bf16 %v1212_v36, %v1211_v35  ;;  %v1661_v35 = vld [vmem:[#allocation11 + $0x140] sm:$0xff] }
 0x239   :  { %2785 = vmatpush3.bf16.msra.mxu1 %v2784_v42  ;;  %2788 = vmatpush3.bf16.msra.mxu0 %v2784_v42  ;;  %v1665_v36 = vld [vmem:[#allocation11 + $0x160] sm:$0xff] }
 0x23a   :  { %2789 = vmatprep.subr.bf16.mxu1 %v3131_v28  ;;  %2796 = vmatprep.subr.bf16.mxu0 %v3131_v28 }
 0x23c   :  { %2632 = vmatmul.mubr.msk.f32.vlgmr.msra.gmra.mrb[4].mxu1 %vm309_vm2, %v656_v43  ;;  %2639 = vmatmul.mubr.msk.f32.vlgmr.msra.gmra.mrb[4].mxu0 %vm309_vm2, %v735_v44  ;;  %v1298_v43 = vld [vmem:[#allocation10 + $0x78] sm:$0x3] }
 0x23d   :  { %2791 = vmatpush3.bf16.msra.mxu1 %v2790_v45  ;;  %2798 = vmatpush3.bf16.msra.mxu0 %v2797_v46  ;;  %v1529_v45 = vld [vmem:[#allocation10 + $0x80] sm:$0xff]  ;;  %v1530_v46 = vld [vmem:[#allocation10 + $0x88] sm:$0xff] }
 0x23e   :  { %2792 = vmatprep.subr.bf16.mxu1 %v3131_v28  ;;  %2799 = vmatprep.subr.bf16.mxu0 %v3131_v28  ;;  %v2840_v47 = vpack.c.bf16 %v1530_v46, %v1529_v45 }
 0x23f   :  { %2649 = vmatprep.mubr.msk.f32.mxu1 %vm3132_vm3, %v3133_v29  ;;  %2660 = vmatprep.mubr.msk.f32.mxu0 %vm3132_vm3, %v3133_v29 }
 0x241   :  { %2795 = vmatpush3.bf16.msk.msra.mxu1 %vm3382_vm6, %v2793_v51  ;;  %2802 = vmatpush3.bf16.msk.msra.mxu0 %vm3382_vm6, %v2800_v52  ;;  %v2843_v52 = vpack.c.bf16 %v1532_v50, %v1531_v49  ;;  %v1631_v49 = vld [vmem:[#allocation11 + $0x50] sm:$0xff] }
 0x242   :  { %2803 = vmatprep.subr.bf16.mxu1 %v3131_v28  ;;  %2806 = vmatprep.subr.bf16.mxu0 %v3131_v28  ;;  %v1635_v50 = vld [vmem:[#allocation11 + $0x70] sm:$0xff] }
 0x30f   :  { %v726_v57 = vpop.f32.mrb[4].mxu1  ;;  %v805_v58 = vpop.f32.mrb[4].mxu0 }
 0x310   :  { %v2640_v59 = vpop.f32.mrb[5].mxu0  ;;  %2650 = vmatmul.mubr.msk.f32.vlgmr.msra.gmra.mrb[6].mxu1 %vm814_vm7, %v805_v58  ;;  %2661 = vmatmul.mubr.msk.f32.vlgmr.msra.gmra.mrb[6].mxu0 %vm814_vm7, %v726_v57  ;;  %v2633_v60 = vpop.f32.mrb[5].mxu1  ;;  %v1534_v57 = vld [vmem:[#allocation10 + $0xa8] sm:$0xff] }
 0x311   :  { %2805 = vmatpush3.bf16.msra.mxu1 %v2784_v42  ;;  %2667 = vmatprep.mubr.msk.f32.mxu1 %vm3132_vm3, %v3133_v29  ;;  %v1297_v42 = vld [vmem:[#allocation10 + $0x70] sm:$0xff]  ;;  %v1536_v60 = vld [vmem:[#allocation10 + $0xb8] sm:$0x3] }
 0x312   :  { %2808 = vmatpush3.bf16.msra.mxu0 %v2807_v56  ;;  %2678 = vmatprep.mubr.msk.f32.mxu0 %vm3132_vm3, %v3133_v29  ;;  %v2823_v44 = vpack.c.bf16 %v1298_v43, %v1297_v42  ;;  %v1533_v56 = vld [vmem:[#allocation10 + $0xa0] sm:$0xff]  ;;  %v1535_v59 = vld [vmem:[#allocation10 + $0xb0] sm:$0xff]  ;;  %v1632_v43 = vld [vmem:[#allocation11 + $0x58] sm:$0xff] }
 0x313   :  { %2809 = vmatprep.subr.bf16.mxu0 %v3131_v28  ;;  %2681 = vmatprep.subr.mxu1 %v3133_v29  ;;  %v2846_v58 = vpack.c.bf16 %v1534_v57, %v1533_v56  ;;  %v1639_v57 = vld [vmem:[#allocation11 + $0x90] sm:$0xff] }
 0x314   :  { %2668 = vmatmul.mubr.msk.f32.vlgmr.msra.gmra.mrb[8].mxu1 %vm309_vm2, %v969_v61  ;;  %v2849_v61 = vpack.c.bf16 %v1536_v60, %v1535_v59  ;;  %v1648_v59 = vld [vmem:[#allocation11 + $0xd8] sm:$0xff] }
 0x315   :  { %2683 = vmatprep.mubr.msk.f32.mxu1 %vm3132_vm3, %v3133_v29  ;;  %v1652_v60 = vld [vmem:[#allocation11 + $0xf8] sm:$0xff] }
 0x316   :  { %2812 = vmatpush3.bf16.msk.msra.mxu0 %vm3382_vm6, %v2810_v0  ;;  %v1624_v0 = vld [vmem:[#allocation11 + $0x18] sm:$0xff]  ;;  %v2892_v62 = vpack.c.bf16 %v1652_v60, %v1648_v59  ;;  %vm1939_vm6 = vcmask 1043456  }
 0x317   :  { %2813 = vmatprep.subr.bf16.mxu0 %v3131_v28 }
 0x3e3   :  { %v888_v3 = vpop.f32.mrb[6].mxu1  ;;  %v964_v4 = vpop.f32.mrb[6].mxu0 }
 0x3e4   :  { %v965_v5 = vadd.f32 %v964_v4, %v888_v3  ;;  %v2651_v6 = vpop.f32.mrb[7].mxu1  ;;  %v2662_v7 = vpop.f32.mrb[7].mxu0  ;;  %v1621_v3 = vld [vmem:[#allocation11] sm:$0xff] }
 0x3e5   :  { %v1625_v4 = vld [vmem:[#allocation11 + $0x20] sm:$0xff]  ;;  %v1630_v7 = vld [vmem:[#allocation11 + $0x48] sm:$0xff] }
 0x3e6   :  { %v2854_v6 = vpack.c.bf16 %v1625_v4, %v1621_v3 }
 0x3e7   :  { %v1039_v8 = vpop.f32.mrb[8].mxu1 }
 0x3e8   :  { %v2669_v9 = vpop.f32.mrb[9].mxu1  ;;  %2679 = vmatmul.mubr.msk.f32.vlgmr.msra.gmra.mrb[8].mxu0 %vm814_vm7, %v1039_v8  ;;  %v1634_v8 = vld [vmem:[#allocation11 + $0x68] sm:$0xff] }
 0x3e9   :  { %2707 = vmatprep.mubr.msk.f32.mxu0 %vm3132_vm3, %v3133_v29  ;;  %2815 = vmatpush3.bf16.msra.mxu0 %v2814_v12  ;;  %v1629_v9 = vld [vmem:[#allocation11 + $0x40] sm:$0xff]  ;;  %v1638_v12 = vld [vmem:[#allocation11 + $0x88] sm:$0xff] }
 0x3ea   :  { %2816 = vmatprep.subr.bf16.mxu0 %v3131_v28  ;;  %v2858_v11 = vpack.c.bf16 %v1633_v10, %v1629_v9  ;;  %v2860_v14 = vpack.c.bf16 %v1642_v13, %v1638_v12  ;;  %v1663_v10 = vld [vmem:[#allocation11 + $0x150] sm:$0xff]  ;;  %v1670_v13 = vld [vmem:[#allocation11 + $0x188] sm:$0xff] }
 0x3ed   :  { %2818 = vmatpush3.bf16.msra.mxu0 %v2817_v15  ;;  %v1637_v15 = vld [vmem:[#allocation11 + $0x80] sm:$0xff] }
 0x3ee   :  { %2819 = vmatprep.subr.bf16.mxu0 %v3131_v28  ;;  %v2862_v17 = vpack.c.bf16 %v1641_v16, %v1637_v15  ;;  %v1672_v15 = vld [vmem:[#allocation11 + $0x198] sm:$0xff] }
 0x3f1   :  { %2821 = vmatpush3.bf16.msra.mxu0 %v2820_v18  ;;  %v1646_v18 = vld [vmem:[#allocation11 + $0xc8] sm:$0xff] }
 0x3f2   :  { %2822 = vmatprep.subr.bf16.mxu0 %v3131_v28 }
 0x3f5   :  { %2825 = vmatpush3.bf16.msk.msra.mxu0 %vm3442_vm10, %v2823_v44  ;;  %v1636_v44 = vld [vmem:[#allocation11 + $0x78] sm:$0xff] }
 0x3f6   :  { %2729 = vmatprep.subr.mxu0 %v3133_v29 }
 0x4bb   :  { %v1120_v19 = vpop.f32.mrb[8].mxu0 }
 0x4bc   :  { %v1124_v20 = vadd.f32 %v1120_v19, %v965_v5  ;;  %v2680_v21 = vpop.f32.mrb[9].mxu0  ;;  %v2880_v5 = vpack.c.bf16 %v1628_v2, %v1624_v0  ;;  %v1650_v19 = vld [vmem:[#allocation11 + $0xe8] sm:$0xff]  ;;  %v1651_v0 = vld [vmem:[#allocation11 + $0xf0] sm:$0xff]  ;;  %v1660_v2 = vld [vmem:[#allocation11 + $0x138] sm:$0xff] }
 0x4bd   :  { %v1645_v21 = vld [vmem:[#allocation11 + $0xc0] sm:$0xff]  ;;  %v2894_v3 = vpack.c.bf16 %v1651_v0, %v1647_v63 }
 0x4be   :  { %v1130_v23 = vadd.f32 %v1128_v22, %v1124_v20  ;;  %v2864_v20 = vpack.c.bf16 %v1650_v19, %v1646_v18  ;;  %v1649_v22 = vld [vmem:[#allocation11 + $0xe0] sm:$0xff] }
 0x4bf   :  { %v1669_v18 = vld [vmem:[#allocation11 + $0x180] sm:$0xff] }
 0x4c0   :  { %v1131_v24 = vmax.f32 %v1130_v23, 0.0  ;;  %v2866_v23 = vpack.c.bf16 %v1649_v22, %v1645_v21  ;;  %v1673_v19 = vld [vmem:[#allocation11 + $0x1a0] sm:$0xff]  ;;  %v1671_v22 = vld [vmem:[#allocation11 + $0x190] sm:$0xff] }
 0x4c1   :  { %v2878_v21 = vpack.c.bf16 %v1673_v19, %v1669_v18 }
 0x4c2   :  { %2682 = vmatpush3.msra.mxu1 %v1131_v24 }
 0x4c3   :  { %2684 = vmatmul.mubr.msk.f32.vlgmr.msra.gmra.mrb[10].mxu1 %vm1133_vm8, %v1132_v25  ;;  %2686 = vmatprep.subr.mxu1 %v3133_v29  ;;  %v1658_v25 = vld [vmem:[#allocation11 + $0x128] sm:$0xff] }
 0x4c4   :  { %2687 = vmatpush3.msra.mxu1 %v1131_v24  ;;  %2688 = vmatprep.mubr.msk.f32.mxu1 %vm3132_vm3, %v3133_v29 }
 0x4c5   :  { %2826 = vmatprep.subr.bf16.mxu1 %v3131_v28 }
 0x4c7   :  { %2689 = vmatmul.mubr.msk.f32.vlgmr.msra.gmra.mrb[12].mxu1 %vm1133_vm8, %v2478_v30  ;;  %v1657_v30 = vld [vmem:[#allocation11 + $0x120] sm:$0xff] }
 0x4c8   :  { %2828 = vmatpush3.bf16.msra.mxu1 %v2827_v31  ;;  %2726 = vmatprep.mubr.msk.f32.mxu1 %vm3132_vm3, %v3133_v29  ;;  %v2870_v31 = vpack.c.bf16 %v1657_v30, %v1653_v27  ;;  %v1677_v27 = vld [vmem:[#allocation11 + $0x1c0] sm:$0x3]  ;;  %v1679_v30 = vld [vmem:[#allocation11 + $0x1d0] sm:$0x3] }
 0x4c9   :  { %2829 = vmatprep.subr.bf16.mxu1 %v3131_v28 }
 0x4cc   :  { %2831 = vmatpush3.bf16.msra.mxu1 %v2830_v34  ;;  %v2872_v34 = vpack.c.bf16 %v1666_v33, %v1662_v32 }
 0x4cd   :  { %2832 = vmatprep.subr.bf16.mxu1 %v3131_v28 }
 0x4d0   :  { %2834 = vmatpush3.bf16.msra.mxu1 %v2833_v37  ;;  %v2874_v37 = vpack.c.bf16 %v1665_v36, %v1661_v35 }
 0x4d1   :  { %2835 = vmatprep.subr.bf16.mxu1 %v3131_v28 }
 0x4d4   :  { %2838 = vmatpush3.bf16.msk.msra.mxu1 %vm3442_vm10, %v2836_v40  ;;  %v1623_v40 = vld [vmem:[#allocation11 + $0x10] sm:$0xff] }
 0x4d5   :  { %2839 = vmatprep.subr.bf16.mxu1 %v3131_v28 }
 0x596   :  { %v1203_v48 = vpop.f32.mrb[10].mxu1 }
 0x597   :  { %v2685_v51 = vpop.f32.mrb[11].mxu1  ;;  %2727 = vmatmul.mubr.msk.f32.vlgmr.msra.gmra.mrb[14].mxu1 %vm1299_vm11, %v1203_v48  ;;  %v2884_v48 = vpack.c.bf16 %v1636_v44, %v1632_v43  ;;  %v3137_v43 = vmov 1   ;;  %v1839_v44 = vlaneseq }
 0x598   :  { %2841 = vmatpush3.bf16.msra.mxu1 %v2840_v47  ;;  %2750 = vmatprep.mubr.msk.f32.mxu1 %vm3132_vm3, %v3133_v29  ;;  %v2882_v47 = vpack.c.bf16 %v1627_v41, %v1623_v40  ;;  %v2112_v41 = vld [vmem:[%s3712_s10 + $0x8] sm:$0x1f] }
 0x599   :  { %2842 = vmatprep.subr.bf16.mxu1 %v3131_v28  ;;  %2947 = vset.pattern.permute.xlu1 %v3137_v43 }
 0x59a   :  { %v1286_v53 = vpop.f32.mrb[12].mxu1 }
 0x59b   :  { %2708 = vmatmul.mubr.msk.f32.vlgmr.msra.gmra.mrb[10].mxu0 %vm1299_vm11, %v1286_v53  ;;  %v2690_v54 = vpop.f32.mrb[13].mxu1  ;;  %v1644_v53 = vld [vmem:[#allocation11 + $0xb8] sm:$0xff] }
 0x59c   :  { %2730 = vmatpush3.msra.mxu0 %v1131_v24  ;;  %2731 = vmatprep.mubr.msk.f32.mxu0 %vm3132_vm3, %v3133_v29  ;;  %v1654_v24 = vld [vmem:[#allocation11 + $0x108] sm:$0xff]  ;;  %vm1952_vm3 = vcmask 1044480  }
 0x59d   :  { %2844 = vmatpush3.bf16.msra.mxu1 %v2843_v52  ;;  %2853 = vmatprep.subr.bf16.mxu0 %v2852_v1  ;;  %v2868_v26 = vpack.c.bf16 %v1658_v25, %v1654_v24  ;;  %v1640_v52 = vld [vmem:[#allocation11 + $0x98] sm:$0xff]  ;;  %v1678_v25 = vld [vmem:[#allocation11 + $0x1c8] sm:$0x3]  ;;  %vm3538_vm7 = vmpackc.low %vm1952_vm3, %vm3134_vm5  ;;  %vm1948_vm5 = vcmask 105472  }
 0x59e   :  { %2845 = vmatprep.subr.bf16.mxu1 %v3131_v28  ;;  %v2888_v56 = vpack.c.bf16 %v1644_v53, %v1640_v52  ;;  %v1656_v1 = vld [vmem:[#allocation11 + $0x118] sm:$0xff] }
 0x59f   :  { %2732 = vmatmul.mubr.msk.f32.vlgmr.msra.gmra.mrb[12].mxu0 %vm1133_vm8, %v2484_v55  ;;  %v2886_v55 = vpack.c.bf16 %v1635_v50, %v1631_v49  ;;  %v2896_v4 = vpack.c.bf16 %v1660_v2, %v1656_v1  ;;  %vm2263_vm8 = vcmask 1040384  }
 0x5a0   :  { %1761 = vmatprep.mubr.f32.mxu0 %v3133_v29  ;;  %2855 = vmatpush1.bf16.msra.mxu0 %v2854_v6  ;;  %v1659_v6 = vld [vmem:[#allocation11 + $0x130] sm:$0xff] }
 0x5a1   :  { %2847 = vmatpush3.bf16.msra.mxu1 %v2846_v58  ;;  %v1643_v58 = vld [vmem:[#allocation11 + $0xb0] sm:$0xff] }
 0x5a2   :  { %2848 = vmatprep.subr.bf16.mxu1 %v3131_v28  ;;  %v2856_v28 = vpack.c.bf16 %v1634_v8, %v1630_v7  ;;  %v1664_v7 = vld [vmem:[#allocation11 + $0x158] sm:$0xff] }
 0x5a3   :  { %v1668_v8 = vld [vmem:[#allocation11 + $0x178] sm:$0xff] }
 0x5a4   :  { %2857 = vmatprep.subr.bf16.mxu0 %v2856_v28  ;;  %v2900_v9 = vpack.c.bf16 %v1668_v8, %v1664_v7 }
 0x5a5   :  { %2851 = vmatpush3.bf16.msk.msra.mxu1 %vm3442_vm10, %v2849_v61  ;;  %2859 = vmatpush1.bf16.msra.mxu0 %v2858_v11  ;;  %v2890_v61 = vpack.c.bf16 %v1643_v58, %v1639_v57  ;;  %v1667_v11 = vld [vmem:[#allocation11 + $0x170] sm:$0xff]  ;;  %vm2350_vm10 = vcmask 1046528  }
 0x5a6   :  { %2881 = vmatprep.subr.bf16.mxu1 %v2880_v5  ;;  %2861 = vmatprep.subr.bf16.mxu0 %v2860_v14  ;;  %v1655_v5 = vld [vmem:[#allocation11 + $0x110] sm:$0xff]  ;;  %v2902_v12 = vpack.c.bf16 %v1667_v11, %v1663_v10  ;;  %v1674_v14 = vld [vmem:[#allocation11 + $0x1a8] sm:$0xff] }
 0x5a7   :  { %v2898_v28 = vpack.c.bf16 %v1659_v6, %v1655_v5  ;;  %v2876_v16 = vpack.c.bf16 %v1674_v14, %v1670_v13 }
 0x5a9   :  { %2863 = vmatpush1.bf16.msra.mxu0 %v2862_v17  ;;  %v1676_v17 = vld [vmem:[#allocation11 + $0x1b8] sm:$0xff] }
 0x5aa   :  { %2865 = vmatprep.subr.bf16.mxu0 %v2864_v20  ;;  %v2904_v20 = vpack.c.bf16 %v1676_v17, %v1672_v15 }
 0x5ad   :  { %2867 = vmatpush1.bf16.msra.mxu0 %v2866_v23  ;;  %v1675_v23 = vld [vmem:[#allocation11 + $0x1b0] sm:$0xff] }
 0x5ae   :  { %2869 = vmatprep.subr.bf16.mxu0 %v2868_v26  ;;  %v2906_v24 = vpack.c.bf16 %v1675_v23, %v1671_v22  ;;  %v1680_v26 = vld [vmem:[#allocation11 + $0x1d8] sm:$0x3]  ;;  %v1892_v23 = vld [vmem:[%s3711_s9] sm:$0xf] }
 0x5b1   :  { %2871 = vmatpush1.bf16.msra.mxu0 %v2870_v31 }
 0x5b2   :  { %2873 = vmatprep.subr.bf16.mxu0 %v2872_v34  ;;  %v1617_v34 = vpop.permute.xlu1 %1616 }
 0x5b5   :  { %2875 = vmatpush1.bf16.msra.mxu0 %v2874_v37 }
 0x5b6   :  { %2877 = vmatprep.subr.bf16.mxu0 %v2876_v16 }
 0x5b9   :  { %2879 = vmatpush1.bf16.msra.mxu0 %v2878_v21 }
 0x5ba   :  { %2488 = vmatprep.subr.msk.mxu0 %vm1303_vm9, %v1678_v25 }
 0x5bd   :  { %2489 = vmatpush1.msk.msra.mxu0 %vm1303_vm9, %v1677_v27 }
 0x66a   :  { %v1449_v38 = vpop.f32.mrb[14].mxu1 }
 0x66b   :  { %v2728_v39 = vpop.f32.mrb[15].mxu1 }
 0x66e   :  { %v1373_v42 = vpop.f32.mrb[10].mxu0 }
 0x66f   :  { %v3468_v45 = vadd.f32 %v1449_v38, %v1373_v42  ;;  %v2709_v46 = vpop.f32.mrb[11].mxu0  ;;  %v2111_v42 = vld [vmem:[%s3712_s10] sm:$0xff] }
 0x672   :  { %v1524_v51 = vpop.f32.mrb[12].mxu0 }
 0x673   :  { %2751 = vmatmul.mubr.msk.f32.vlgmr.msra.gmra.mrb[16].mxu1 %vm1299_vm11, %v1524_v51  ;;  %v2733_v54 = vpop.f32.mrb[13].mxu0 }
 0x674   :  { %2883 = vmatpush1.bf16.msra.mxu1 %v2882_v47  ;;  %1832 = vmatprep.mubr.f32.mxu1 %v3133_v29 }
 0x675   :  { %2885 = vmatprep.subr.bf16.mxu1 %v2884_v48 }
 0x678   :  { %2887 = vmatpush1.bf16.msra.mxu1 %v2886_v55 }
 0x679   :  { %2889 = vmatprep.subr.bf16.mxu1 %v2888_v56 }
 0x67c   :  { %2891 = vmatpush1.bf16.msra.mxu1 %v2890_v61 }
 0x67d   :  { %2893 = vmatprep.subr.bf16.mxu1 %v2892_v62 }
 0x680   :  { %2895 = vmatpush1.bf16.msra.mxu1 %v2894_v3 }
 0x681   :  { %2897 = vmatprep.subr.bf16.mxu1 %v2896_v4 }
 0x684   :  { %2899 = vmatpush1.bf16.msra.mxu1 %v2898_v28 }
 0x685   :  { %2901 = vmatprep.subr.bf16.mxu1 %v2900_v9 }
 0x688   :  { %2903 = vmatpush1.bf16.msra.mxu1 %v2902_v12 }
 0x689   :  { %2905 = vmatprep.subr.bf16.mxu1 %v2904_v20 }
 0x68c   :  { %2907 = vmatpush1.bf16.msra.mxu1 %v2906_v24 }
 0x68d   :  { %2491 = vmatprep.subr.msk.mxu1 %vm1303_vm9, %v1680_v26 }
 0x690   :  { %2492 = vmatpush1.msk.msra.mxu1 %vm1303_vm9, %v1679_v30 }
 0x746   :  { %v1609_v31 = vpop.f32.mrb[16].mxu1 }
 0x747   :  { %v1613_v32 = vadd.f32 %v1609_v31, %v3468_v45  ;;  %v2752_v33 = vpop.f32.mrb[17].mxu1  ;;  %v3505_v45 = vand.u32 127, %v1839_v44 }
 0x749   :  { %v1619_v35 = vadd.f32 %v1617_v34, %v1613_v32  ;;  %v1841_v46 = vadd.s32 128, %v3505_v45  ;;  %v1843_v48 = vadd.s32 384, %v3505_v45  ;;  %vm1844_vm14 = vcmp.eq.s32.totalorder %v3505_v45, 0 }
 0x74a   :  { %v1842_v51 = vadd.s32 256, %v3505_v45  ;;  %vm1918_vm15 = vcmp.lt.s32.totalorder %v3505_v45, 127  ;;  %v2494_v53 = vsel %vm1844_vm14, 1.0, %v3133_v29  ;;  %vm1901_vm2 = vcmp.lt.s32.totalorder %v3505_v45, 1 }
 0x74b   :  { %v1620_v36 = vmax.f32 %v1619_v35, 0.0  ;;  %vm1849_vm13 = vcmp.eq.s32.totalorder %v1841_v46, 255  ;;  %vm1863_vm0 = vcmp.eq.s32.totalorder %v1843_v48, 511  ;;  %v3520_v58 = vsub.f32 1.0, %v2494_v53 }
 0x74c   :  { %v2496_v47 = vsel %vm1849_vm13, 1.0, %v3133_v29  ;;  %vm1854_vm1 = vcmp.eq.s32.totalorder %v1842_v51, 256  ;;  %v2497_v59 = vsel %vm1863_vm0, 1.0, %v3133_v29 }
 0x74d   :  { %2490 = vmatmul.mubr.msk.f32.vlgmr.msra.gmra.mrb[14].mxu0 %vm1681_vm12, %v1620_v36  ;;  %2493 = vmatmul.mubr.msk.f32.vlgmr.msra.gmra.mrb[18].mxu1 %vm1681_vm12, %v1620_v36  ;;  %v3512_v52 = vsub.f32 1.0, %v2496_v47  ;;  %v2495_v63 = vsel %vm1854_vm1, 1.0, %v3133_v29  ;;  %v3530_v3 = vsub.f32 1.0, %v2497_v59 }
 0x74e   :  { %2029 = vmatprep.mubr.f32.mxu0 %v3133_v29  ;;  %v3542_v9 = vsub.f32 1.0, %v2495_v63 }
 0x820   :  { %v3478_v37 = vpop.f32.mrb[14].mxu0  ;;  %v3480_v38 = vpop.f32.mrb[18].mxu1 }
 0x821   :  { %1893 = vrot.lane.b32.xlu0 %v3478_v37, %s3135_s5  ;;  %v1765_v39 = vpop.f32.mrb[15].mxu0  ;;  %1914 = vrot.lane.b32.xlu1 %v3480_v38, %s3136_s4  ;;  %v3486_v40 = vpop.f32.mrb[19].mxu1  ;;  %v1931_v4 = vrot.slane %v3478_v37, 4  ;;  %v1933_v21 = vrot.slane %v3480_v38, 4 }
 0x822   :  { %v1932_v60 = vrot.slane %v1765_v39, 4  ;;  %v1934_v17 = vrot.slane %v3486_v40, 4 }
 0x825   :  { %1912 = vrot.lane.b32.xlu0 %v1765_v39, %s3136_s4  ;;  %1910 = vrot.lane.b32.xlu1 %v3478_v37, %s3136_s4 }
 0x829   :  { %1895 = vrot.lane.b32.xlu0 %v1765_v39, %s3135_s5  ;;  %1899 = vrot.lane.b32.xlu1 %v3486_v40, %s3135_s5  ;;  %v2272_v39 = vld [vmem:[%s3713_s11] sm:$0x7f]  ;;  %s3139_s11 = smov [#allocation13]  }
 0x82a   :  { %s2431_s2 = sshll.u32 %s3139_s11, 4  ;;  %s2432_s2 = int_to_ptr.vmem [resolvable:$true] %s2431_s2 }
 0x82b   :  { %s3088_s3 = scalar_lea.vmem %s2432_s2, 64  ;;  %p3093_p7 = scmp.lt.s32.totalorder %s2432_s2, %s2432_s2 }
 0x82c   :  { %p3089_p6 = scmp.ne.s32.totalorder %s2432_s2, %s3088_s3  ;;  %p3094_p8 = scmp.lt.s32.totalorder %s3088_s3, %s3088_s3 }
 0x82d   :  { %1916 = vrot.lane.b32.xlu0 %v3486_v40, %s3136_s4  ;;  %1897 = vrot.lane.b32.xlu1 %v3480_v38, %s3135_s5 }
 0x82e   :  { %p3095_p9 = por %p3094_p8, %p3093_p7 }
 0x830   :  { %p3096_p10 = pnand %p3095_p9, %p3089_p6 }
 0x831   :  { %2172 = vperm.xlu0 %2945, %v2112_v41   ;;  %2220 = vperm.xlu1 %2947, %v2112_v41  }
 0x835   :  { %2167 = vperm.xlu0 %2945, %v2111_v42   ;;  %2216 = vperm.xlu1 %2947, %v2111_v42  }
 0x893   :  { %v1894_v49 = vpop.permute.xlu0 %1893  ;;  %v1915_v50 = vpop.permute.xlu1 %1914 }
 0x897   :  { %v1913_v54 = vpop.permute.xlu0 %1912  ;;  %v1911_v55 = vpop.permute.xlu1 %1910 }
 0x898   :  { %v1920_v56 = vsel %vm1918_vm15, %v1913_v54, %v1915_v50  ;;  %v1921_v0 = vsel %vm1918_vm15, %v1911_v55, %v1913_v54 }
 0x899   :  { %v1924_v57 = vmul.f32 %v1920_v56, %v3512_v52  ;;  %v1944_v10 = vsel %vm1939_vm6, %v1921_v0, 1.0 }
 0x89b   :  { %v1896_v61 = vpop.permute.xlu0 %1895  ;;  %v1900_v62 = vpop.permute.xlu1 %1899  ;;  %v1945_v5 = vsel %vm1939_vm6, %v1924_v57, 1.0 }
 0x89c   :  { %v1904_v1 = vsel %vm1901_vm2, %v1894_v49, %v1896_v61  ;;  %v1905_v2 = vsel %vm1901_vm2, %v1900_v62, %v1894_v49 }
 0x89d   :  { %v1941_v6 = vsel %vm1939_vm6, %v1904_v1, %v1932_v60  ;;  %v1906_v7 = vmul.f32 %v1905_v2, %v3520_v58 }
 0x89e   :  { %v2908_v28 = vpack.c.bf16 %v1945_v5, %v1941_v6 }
 0x89f   :  { %v1940_v11 = vsel %vm1939_vm6, %v1906_v7, %v1931_v4  ;;  %v1917_v12 = vpop.permute.xlu0 %1916  ;;  %v1898_v13 = vpop.permute.xlu1 %1897 }
 0x8a0   :  { %v2911_v14 = vpack.c.bf16 %v1944_v10, %v1940_v11  ;;  %v1922_v15 = vsel %vm1918_vm15, %v1917_v12, %v1911_v55  ;;  %v1902_v16 = vsel %vm1901_vm2, %v1898_v13, %v1900_v62  ;;  %2910 = vmatprep.subr.msk.bf16.mxu0 %vm3538_vm7, %v2908_v28  ;;  %v1919_v18 = vsel %vm1918_vm15, %v1915_v50, %v1917_v12 }
 0x8a1   :  { %v1926_v19 = vmul.f32 %v1922_v15, %v3530_v3  ;;  %v1903_v20 = vsel %vm1901_vm2, %v1896_v61, %v1898_v13  ;;  %v1943_v25 = vsel %vm1939_vm6, %v1902_v16, %v1934_v17  ;;  %v1946_v26 = vsel %vm1939_vm6, %v1919_v18, 1.0 }
 0x8a2   :  { %v1908_v22 = vmul.f32 %v1903_v20, %v3542_v9  ;;  %2913 = vmatpush1.bf16.msk.msra.mxu0 %vm3538_vm7, %v2911_v14 }
 0x8a3   :  { %v1947_v24 = vsel %vm1939_vm6, %v1926_v19, 1.0 }
 0x8a4   :  { %v1942_v27 = vsel %vm1939_vm6, %v1908_v22, %v1933_v21  ;;  %v2914_v30 = vpack.c.bf16 %v1947_v24, %v1943_v25 }
 0x8a5   :  { %v2917_v31 = vpack.c.bf16 %v1946_v26, %v1942_v27  ;;  %2500 = vmatmul.mubr.msk.f32.vlgmr.msra.gmra.mrb[16].mxu0 %vm1948_vm5, %v1892_v23 }
 0x8a6   :  { %2916 = vmatprep.subr.msk.bf16.mxu0 %vm3538_vm7, %v2914_v30  ;;  %2100 = vmatprep.mubr.f32.mxu0 %v3133_v29 }
 0x8a7   :  { %2919 = vmatpush1.bf16.msk.msra.mxu0 %vm3538_vm7, %v2917_v31 }
 0x8aa   :  { %2503 = vmatmul.mubr.msk.f32.vlgmr.msra.gmra.mrb[18].mxu0 %vm1948_vm5, %v1892_v23 }
 0x8b0   :  { %v2221_v40 = vpop.permute.xlu1 %2220  ;;  %v2173_v41 = vpop.permute.xlu0 %2172 }
 0x8b4   :  { %v3589_v42 = vpop.permute.xlu1 %2216  ;;  %v3591_v43 = vpop.permute.xlu0 %2167 }
 0x978   :  { %v2031_v32 = vpop.f32.mrb[16].mxu0 }
 0x979   :  { %v3574_v33 = vmax.f32 %v2031_v32, 0.0  ;;  %v2033_v34 = vpop.f32.mrb[17].mxu0 }
 0x97a   :  { %v2108_v35 = vmax.f32 %v2033_v34, 0.0 }
 0x97b   :  { %2129 = vrot.lane.b32.xlu0 %v3574_v33, %s3136_s4  ;;  %v2149_v57 = vrot.slane %v3574_v33, 4 }
 0x97c   :  { %2131 = vrot.lane.b32.xlu1 %v2108_v35, %s3136_s4  ;;  %v2150_v54 = vrot.slane %v2108_v35, 4 }
 0x97d   :  { %v2102_v36 = vpop.f32.mrb[18].mxu0 }
 0x97e   :  { %v2104_v37 = vpop.f32.mrb[19].mxu0  ;;  %v2109_v29 = vmax.f32 %v2102_v36, 0.0 }
 0x97f   :  { %2113 = vrot.lane.b32.xlu0 %v3574_v33, %s3135_s5  ;;  %v2110_v38 = vmax.f32 %v2104_v37, 0.0 }
 0x980   :  { %2115 = vrot.lane.b32.xlu1 %v2108_v35, %s3135_s5  ;;  %v2151_v62 = vrot.slane %v2109_v29, 4 }
 0x981   :  { %v2152_v2 = vrot.slane %v2110_v38, 4 }
 0x983   :  { %2133 = vrot.lane.b32.xlu0 %v2109_v29, %s3136_s4 }
 0x984   :  { %2135 = vrot.lane.b32.xlu1 %v2110_v38, %s3136_s4 }
 0x987   :  { %2117 = vrot.lane.b32.xlu0 %v2109_v29, %s3135_s5 }
 0x988   :  { %2119 = vrot.lane.b32.xlu1 %v2110_v38, %s3135_s5 }
 0x98b   :  { %2343 = vperm.xlu0 %2945, %v2272_v39  }
 0x9ed   :  { %v2130_v46 = vpop.permute.xlu0 %2129 }
 0x9ee   :  { %v2132_v47 = vpop.permute.xlu1 %2131 }
 0x9ef   :  { %v2139_v48 = vsel %vm1918_vm15, %v2130_v46, %v2132_v47 }
 0x9f0   :  { %v2161_v50 = vsel %vm1939_vm6, %v2139_v48, 1.0 }
 0x9f1   :  { %v2114_v49 = vpop.permute.xlu0 %2113  ;;  %v2179_v55 = vmul.f32 %v2173_v41, %v2161_v50  ;;  %v2227_v4 = vmul.f32 %v2221_v40, %v2161_v50 }
 0x9f2   :  { %v2116_v51 = vpop.permute.xlu1 %2115 }
 0x9f3   :  { %v2123_v53 = vsel %vm1901_vm2, %v2114_v49, %v2116_v51  ;;  %v2183_v7 = vsel %vm1952_vm3, %v2179_v55, 0.0  ;;  %v2231_v50 = vsel %vm1952_vm3, %v2227_v4, 0.0 }
 0x9f4   :  { %v2158_v59 = vsel %vm1939_vm6, %v2123_v53, %v2150_v54 }
 0x9f5   :  { %v2134_v56 = vpop.permute.xlu0 %2133  ;;  %v2176_v8 = vmul.f32 %v3591_v43, %v2158_v59  ;;  %v2224_v17 = vmul.f32 %v3589_v42, %v2158_v59 }
 0x9f6   :  { %v2138_v60 = vsel %vm1918_vm15, %v2132_v47, %v2134_v56  ;;  %v2136_v61 = vpop.permute.xlu1 %2135 }
 0x9f7   :  { %v2142_v63 = vmul.f32 %v2138_v60, %v3512_v52  ;;  %v2137_v0 = vsel %vm1918_vm15, %v2134_v56, %v2136_v61  ;;  %v2140_v1 = vsel %vm1918_vm15, %v2136_v61, %v2130_v46 }
 0x9f8   :  { %v2144_v5 = vmul.f32 %v2140_v1, %v3530_v3  ;;  %v2163_v6 = vsel %vm1939_vm6, %v2137_v0, 1.0 }
 0x9f9   :  { %v2162_v28 = vsel %vm1939_vm6, %v2142_v63, 1.0  ;;  %v2181_v10 = vmul.f32 %v2173_v41, %v2163_v6  ;;  %v2118_v11 = vpop.permute.xlu0 %2117  ;;  %v2229_v19 = vmul.f32 %v2221_v40, %v2163_v6 }
 0x9fa   :  { %v2180_v12 = vmul.f32 %v2173_v41, %v2162_v28  ;;  %v2228_v13 = vmul.f32 %v2221_v40, %v2162_v28  ;;  %v2164_v14 = vsel %vm1939_vm6, %v2144_v5, 1.0  ;;  %v2122_v15 = vsel %vm1901_vm2, %v2116_v51, %v2118_v11  ;;  %v2120_v16 = vpop.permute.xlu1 %2119 }
 0x9fb   :  { %v2182_v18 = vmul.f32 %v2173_v41, %v2164_v14  ;;  %v2230_v20 = vmul.f32 %v2221_v40, %v2164_v14  ;;  %v2127_v23 = vmul.f32 %v2122_v15, %v3542_v9  ;;  %v2121_v24 = vsel %vm1901_vm2, %v2118_v11, %v2120_v16 }
 0x9fc   :  { %v2191_v21 = vsel %vm1952_vm3, %v2180_v12, 0.0  ;;  %v2239_v22 = vsel %vm1952_vm3, %v2228_v13, 0.0  ;;  %v2199_v27 = vsel %vm1952_vm3, %v2181_v10, 0.0  ;;  %v2124_v33 = vsel %vm1901_vm2, %v2120_v16, %v2114_v49 }
 0x9fd   :  { %v2192_v25 = vadd.f32 %v2191_v21, %v2176_v8  ;;  %v2240_v26 = vadd.f32 %v2239_v22, %v2224_v17  ;;  %v2207_v30 = vsel %vm1952_vm3, %v2182_v18, 0.0  ;;  %v2255_v31 = vsel %vm1952_vm3, %v2230_v20, 0.0 }
 0x9fe   :  { %v2159_v32 = vsel %vm1939_vm6, %v2127_v23, %v2151_v62  ;;  %v2160_v34 = vsel %vm1939_vm6, %v2121_v24, %v2152_v2  ;;  %v2247_v38 = vsel %vm1952_vm3, %v2229_v19, 0.0  ;;  %v2125_v39 = vmul.f32 %v2124_v33, %v3520_v58 }
 0x9ff   :  { %v2193_v35 = vrot.slane %v2192_v25, 4  ;;  %v2241_v36 = vrot.slane %v2240_v26, 4  ;;  %v2177_v37 = vmul.f32 %v3591_v43, %v2159_v32  ;;  %v2225_v29 = vmul.f32 %v3589_v42, %v2159_v32 }
 0xa00   :  { %v2178_v40 = vmul.f32 %v3591_v43, %v2160_v34  ;;  %v2226_v41 = vmul.f32 %v3589_v42, %v2160_v34  ;;  %v2157_v51 = vsel %vm1939_vm6, %v2125_v39, %v2149_v57 }
 0xa01   :  { %v2194_v46 = vadd.f32 %v2193_v35, %v2192_v25  ;;  %v2242_v47 = vadd.f32 %v2241_v36, %v2240_v26  ;;  %v2200_v48 = vadd.f32 %v2199_v27, %v2177_v37  ;;  %v2248_v49 = vadd.f32 %v2247_v38, %v2225_v29 }
 0xa02   :  { %v2208_v53 = vadd.f32 %v2207_v30, %v2178_v40  ;;  %v2256_v54 = vadd.f32 %v2255_v31, %v2226_v41  ;;  %v2175_v59 = vmul.f32 %v3591_v43, %v2157_v51  ;;  %v2223_v60 = vmul.f32 %v3589_v42, %v2157_v51 }
 0xa03   :  { %v2201_v55 = vrot.slane %v2200_v48, 4  ;;  %v2249_v56 = vrot.slane %v2248_v49, 4  ;;  %v2195_v63 = vrot.slane %v2194_v46, 2  ;;  %v2243_v0 = vrot.slane %v2242_v47, 2 }
 0xa04   :  { %v2209_v61 = vrot.slane %v2208_v53, 4  ;;  %v2257_v62 = vrot.slane %v2256_v54, 4  ;;  %v2184_v5 = vadd.f32 %v2183_v7, %v2175_v59  ;;  %v2232_v6 = vadd.f32 %v2231_v50, %v2223_v60 }
 0xa05   :  { %v2202_v1 = vadd.f32 %v2201_v55, %v2200_v48  ;;  %v2250_v2 = vadd.f32 %v2249_v56, %v2248_v49  ;;  %v2196_v28 = vadd.f32 %v2195_v63, %v2194_v46  ;;  %v2244_v57 = vadd.f32 %v2243_v0, %v2242_v47 }
 0xa06   :  { %v2210_v8 = vadd.f32 %v2209_v61, %v2208_v53  ;;  %v2258_v4 = vadd.f32 %v2257_v62, %v2256_v54  ;;  %v2185_v10 = vrot.slane %v2184_v5, 4  ;;  %v2233_v11 = vrot.slane %v2232_v6, 4 }
 0xa07   :  { %v2203_v12 = vrot.slane %v2202_v1, 2  ;;  %v2251_v13 = vrot.slane %v2250_v2, 2  ;;  %v2197_v15 = vrot.slane %v2196_v28, 1  ;;  %v2245_v42 = vrot.slane %v2244_v57, 1 }
 0xa08   :  { %v2211_v14 = vrot.slane %v2210_v8, 2  ;;  %v2259_v43 = vrot.slane %v2258_v4, 2  ;;  %v2186_v16 = vadd.f32 %v2185_v10, %v2184_v5  ;;  %v2234_v17 = vadd.f32 %v2233_v11, %v2232_v6 }
 0xa09   :  { %v2204_v18 = vadd.f32 %v2203_v12, %v2202_v1  ;;  %v2252_v19 = vadd.f32 %v2251_v13, %v2250_v2  ;;  %v2198_v20 = vadd.f32 %v2197_v15, %v2196_v28  ;;  %v2246_v21 = vadd.f32 %v2245_v42, %v2244_v57 }
 0xa0a   :  { %v2212_v7 = vadd.f32 %v2211_v14, %v2210_v8  ;;  %v2260_v22 = vadd.f32 %v2259_v43, %v2258_v4  ;;  %v2187_v25 = vrot.slane %v2186_v16, 2  ;;  %v2235_v26 = vrot.slane %v2234_v17, 2  ;;  %v2344_v53 = vpop.permute.xlu0 %2343 }
 0xa0b   :  { %v2205_v23 = vrot.slane %v2204_v18, 1  ;;  %v2253_v24 = vrot.slane %v2252_v19, 1  ;;  %v2265_v27 = vsel %vm2263_vm8, %v2198_v20, %v2246_v21 }
 0xa0c   :  { %v2269_v30 = vmax.f32 %v2265_v27, 0.0  ;;  %v2188_v33 = vadd.f32 %v2187_v25, %v2186_v16  ;;  %v2236_v34 = vadd.f32 %v2235_v26, %v2234_v17  ;;  %v2213_v35 = vrot.slane %v2212_v7, 1 }
 0xa0d   :  { %v2206_v31 = vadd.f32 %v2205_v23, %v2204_v18  ;;  %v2254_v32 = vadd.f32 %v2253_v24, %v2252_v19  ;;  %v2261_v36 = vrot.slane %v2260_v22, 1 }
 0xa0e   :  { %2291 = vrot.lane.b32.xlu1 %v2269_v30, %s3136_s4  ;;  %v2189_v29 = vrot.slane %v2188_v33, 1  ;;  %v2237_v39 = vrot.slane %v2236_v34, 1  ;;  %v2214_v46 = vadd.f32 %v2213_v35, %v2212_v7  ;;  %v2310_v63 = vrot.slane %v2269_v30, 6 }
 0xa0f   :  { %v2266_v37 = vsel %vm2263_vm8, %v2206_v31, %v2254_v32  ;;  %v2262_v47 = vadd.f32 %v2261_v36, %v2260_v22 }
 0xa10   :  { %v2270_v38 = vmax.f32 %v2266_v37, 0.0  ;;  %v2190_v40 = vadd.f32 %v2189_v29, %v2188_v33  ;;  %v2238_v41 = vadd.f32 %v2237_v39, %v2236_v34 }
 0xa11   :  { %v2267_v50 = vsel %vm2263_vm8, %v2214_v46, %v2262_v47 }
 0xa12   :  { %2293 = vrot.lane.b32.xlu0 %v2270_v38, %s3136_s4  ;;  %v2264_v48 = vsel %vm2263_vm8, %v2190_v40, %v2238_v41  ;;  %v2271_v51 = vmax.f32 %v2267_v50, 0.0  ;;  %v2311_v4 = vrot.slane %v2270_v38, 6 }
 0xa13   :  { %v2268_v49 = vmax.f32 %v2264_v48, 0.0 }
 0xa14   :  { %v2312_v57 = vrot.slane %v2271_v51, 6 }
 0xa15   :  { %2273 = vrot.lane.b32.xlu1 %v2268_v49, %s3135_s5  ;;  %v2309_v16 = vrot.slane %v2268_v49, 6 }
 0xa16   :  { %2289 = vrot.lane.b32.xlu0 %v2268_v49, %s3136_s4 }
 0xa19   :  { %2295 = vrot.lane.b32.xlu1 %v2271_v51, %s3136_s4 }
 0xa1a   :  { %2275 = vrot.lane.b32.xlu0 %v2269_v30, %s3135_s5 }
 0xa1d   :  { %2277 = vrot.lane.b32.xlu1 %v2270_v38, %s3135_s5 }
 0xa1e   :  { %2279 = vrot.lane.b32.xlu0 %v2271_v51, %s3135_s5 }
 0xa80   :  { %v2292_v54 = vpop.permute.xlu1 %2291 }
 0xa84   :  { %v2294_v55 = vpop.permute.xlu0 %2293 }
 0xa85   :  { %v2298_v56 = vsel %vm1918_vm15, %v2292_v54, %v2294_v55 }
 0xa86   :  { %v2302_v61 = vmul.f32 %v2298_v56, %v3512_v52 }
 0xa87   :  { %v2274_v59 = vpop.permute.xlu1 %2273 }
 0xa88   :  { %v2290_v60 = vpop.permute.xlu0 %2289  ;;  %v2322_v1 = vrot.slane %v2302_v61, 4 }
 0xa89   :  { %v2299_v52 = vsel %vm1918_vm15, %v2290_v60, %v2292_v54 }
 0xa8a   :  { %v2321_v20 = vrot.slane %v2299_v52, 4 }
 0xa8b   :  { %v2296_v62 = vpop.permute.xlu1 %2295 }
 0xa8c   :  { %v2276_v0 = vpop.permute.xlu0 %2275  ;;  %v2300_v2 = vsel %vm1918_vm15, %v2296_v62, %v2290_v60  ;;  %v2297_v10 = vsel %vm1918_vm15, %v2294_v55, %v2296_v62 }
 0xa8d   :  { %v2283_v5 = vsel %vm1901_vm2, %v2274_v59, %v2276_v0  ;;  %v2304_v6 = vmul.f32 %v2300_v2, %v3530_v3  ;;  %v2323_v21 = vrot.slane %v2297_v10, 4 }
 0xa8e   :  { %v2330_v8 = vsel %vm1303_vm9, %v2283_v5, %v2310_v63 }
 0xa8f   :  { %v2334_v28 = vsel %vm1939_vm6, %v2330_v8, %v2322_v1  ;;  %v2324_v11 = vrot.slane %v2304_v6, 4  ;;  %v2278_v13 = vpop.permute.xlu1 %2277  ;;  %v3138_v1 = vmov 1966171168   ;;  %v2390_v6 = vshrl.u32 %v1839_v44, 7 }
 0xa90   :  { %v2338_v12 = vsel %vm818_vm4, %v2334_v28, 1.0  ;;  %v2280_v14 = vpop.permute.xlu0 %2279  ;;  %v2282_v3 = vsel %vm1901_vm2, %v2276_v0, %v2278_v13  ;;  %v2387_v2 = vunpack.c.l.s4 %v3138_v1 }
 0xa91   :  { %v2347_v43 = vmul.f32 %v2344_v53, %v2338_v12  ;;  %v2281_v15 = vsel %vm1901_vm2, %v2278_v13, %v2280_v14  ;;  %v2284_v42 = vsel %vm1901_vm2, %v2280_v14, %v2274_v59  ;;  %v2287_v17 = vmul.f32 %v2282_v3, %v3542_v9 }
 0xa92   :  { %v2285_v18 = vmul.f32 %v2284_v42, %v3520_v58  ;;  %v2332_v19 = vsel %vm1303_vm9, %v2281_v15, %v2312_v57  ;;  %v2388_v5 = vunpack.c.0.s8 %v2387_v2 }
 0xa93   :  { %v2358_v7 = vsel %vm2350_vm10, %v2347_v43, 0.0  ;;  %v2336_v22 = vsel %vm1939_vm6, %v2332_v19, %v2324_v11  ;;  %v2331_v24 = vsel %vm1303_vm9, %v2287_v17, %v2311_v4 }
 0xa94   :  { %v2359_v23 = vrot.slane %v2358_v7, 4  ;;  %v2329_v25 = vsel %vm1303_vm9, %v2285_v18, %v2309_v16  ;;  %v2340_v45 = vsel %vm818_vm4, %v2336_v22, 1.0  ;;  %v2335_v26 = vsel %vm1939_vm6, %v2331_v24, %v2323_v21 }
 0xa95   :  { %v2333_v9 = vsel %vm1939_vm6, %v2329_v25, %v2321_v20  ;;  %v2349_v58 = vmul.f32 %v2344_v53, %v2340_v45  ;;  %v2339_v30 = vsel %vm818_vm4, %v2335_v26, 1.0  ;;  %v2391_v28 = vsub.s32 %v2388_v5, %v2390_v6 }
 0xa96   :  { %v2360_v27 = vadd.f32 %v2359_v23, %v2358_v7  ;;  %v2337_v31 = vsel %vm818_vm4, %v2333_v9, 1.0  ;;  %v2348_v32 = vmul.f32 %v2344_v53, %v2339_v30  ;;  %vm2403_vm4 = vcmp.lt.s32.totalorder %v1839_v44, 256 }
 0xa97   :  { %v2346_v33 = vmul.f32 %v2344_v53, %v2337_v31  ;;  %v2372_v34 = vsel %vm2350_vm10, %v2349_v58, 0.0 }
 0xa98   :  { %v2361_v35 = vrot.slane %v2360_v27, 2  ;;  %v2373_v36 = vrot.slane %v2372_v34, 4  ;;  %v2365_v37 = vsel %vm2350_vm10, %v2348_v32, 0.0 }
 0xa99   :  { %v2351_v29 = vsel %vm2350_vm10, %v2346_v33, 0.0  ;;  %v2366_v39 = vrot.slane %v2365_v37, 4 }
 0xa9a   :  { %v2362_v38 = vadd.f32 %v2361_v35, %v2360_v27  ;;  %v2352_v40 = vrot.slane %v2351_v29, 4  ;;  %v2374_v41 = vadd.f32 %v2373_v36, %v2372_v34 }
 0xa9b   :  { %v2367_v46 = vadd.f32 %v2366_v39, %v2365_v37 }
 0xa9c   :  { %v2353_v47 = vadd.f32 %v2352_v40, %v2351_v29  ;;  %v2375_v48 = vrot.slane %v2374_v41, 2  ;;  %v2363_v49 = vrot.slane %v2362_v38, 1 }
 0xa9d   :  { %v2368_v50 = vrot.slane %v2367_v46, 2 }
 0xa9e   :  { %v2354_v51 = vrot.slane %v2353_v47, 2  ;;  %v2376_v54 = vadd.f32 %v2375_v48, %v2374_v41  ;;  %v2364_v59 = vadd.f32 %v2363_v49, %v2362_v38 }
 0xa9f   :  { %v2369_v53 = vadd.f32 %v2368_v50, %v2367_v46 }
 0xaa0   :  { %v2355_v55 = vadd.f32 %v2354_v51, %v2353_v47  ;;  %v2377_v56 = vrot.slane %v2376_v54, 1 }
 0xaa1   :  { %v2370_v60 = vrot.slane %v2369_v53, 1 }
 0xaa2   :  { %v2356_v61 = vrot.slane %v2355_v55, 1  ;;  %v2378_v62 = vadd.f32 %v2377_v56, %v2376_v54 }
 0xaa3   :  { %v2371_v63 = vadd.f32 %v2370_v60, %v2369_v53 }
 0xaa4   :  { %v2357_v0 = vadd.f32 %v2356_v61, %v2355_v55  ;;  %2948 = vtanh.f32 %v2378_v62 }
 0xaa5   :  { %2950 = vtanh.f32 %v2364_v59 }
 0xaa6   :  { %2952 = vtanh.f32 %v2371_v63 }
 0xaa7   :  { %2954 = vtanh.f32 %v2357_v0 }
 0xaae   :  { %v2949_v8 = vpop.eup %2948 }
 0xaaf   :  { %v2951_v4 = vpop.eup %2950 }
 0xab0   :  { %v2953_v57 = vpop.eup %2952 }
 0xab1   :  { %v2955_v52 = vpop.eup %2954  ;;  %v2408_v10 = vcombine.low %v2953_v57, %v2949_v8 }
 0xab2   :  { %v2385_v11 = vcombine.low %v2955_v52, %v2951_v4 }
 0xab3   :  { %v2415_v12 = vrot.slane %v2408_v10, %v2391_v28 }
 0xab4   :  { %v2392_v13 = vrot.slane %v2385_v11, %v2391_v28 }
 0xab5   :  { %v2422_v14 = vrot.slane %v2415_v12, %v2391_v28 }
 0xab6   :  { %v2399_v43 = vrot.slane %v2392_v13, %v2391_v28 }
 0xab7   :  { %2425 = vst.msk [vmem:[#allocation13 + $0x2] sm:$0x3] %vm2403_vm4, %v2422_v14 }
 0xab8   :  { %2405 = vst.msk [vmem:[#allocation13] sm:$0x3] %vm2403_vm4, %v2399_v43 }
 0xab9   :  { %3099 = shalt.err (!%p3096_p10)
}
 0xaba   :  { %s3100_s29 = scalar_lea.hbm %s3714_s12, 64 }
 0xabb   :  { %p3101_p11 = scmp.ne.s32.totalorder %s3714_s12, %s3100_s29  ;;  %p3104_p12 = scmp.lt.u32.totalorder %s3100_s29, %s3714_s12 }
 0xabd   :  { %p3106_p13 = pnand %p3104_p12, %p3101_p11 }
 0xabf   :  { %3109 = shalt.err (!%p3106_p13)
}
 0xac0   :  { %s3140_s0 = smov 2  }
 0xac1   :  { %2437 = dma.vmem_to_hbm [thread:$0]  %s2432_s2, 64, %s3714_s12, [#allocation4], %s3129_s15, %s3129_s15, %s3140_s0  }
 0xac2   :  { %3118 = dma.done.wait [#allocation4], 64  }
 0xac3   :  { %3119 = vsyncadd [#allocation4], 4294967232 }
 0xac4   :  { %2441 = vsyncpa [#allocation3], 1 }
 0xac5   :  { %2442 = vsyncpa [#allocation6], 1 }
 0xac6   :  { %2443 = vsyncpa [#allocation9], 1 }
 0xac7   :  { %2444 = vsyncpa [#allocation12], 1 }
 0xac8   :  { %2445 = vsyncpa [#allocation4], 1 }

</bundles_post_ra>
